<compile_context>
chip_gen: v7x
topology: tpu7x:2x2x1
jax: 0.10.0
libtpu: 0.0.40
codegen_flags: <defaults>
</compile_context>

<pallas_src>
import functools

import jax
import jax.numpy as jnp
from jax import lax
from jax.experimental import pallas as pl
from jax.experimental.pallas import tpu as pltpu

BN_EPS = 1e-5
VMEM_LIMIT = 32 * 1024 * 1024  # safe on v5e/v6e/v7x; actual footprint < 1 MiB


def _fused_conv_bn_relu_kernel(x_ref, w_ref, g_ref, b_ref, o_ref, *, m_rows):
    """Fused block: conv-as-matmul (MXU, f32 acc) -> BN batch stats (sublane
    reduces) -> per-channel scale/shift (VPU + EUP rsqrt) -> normalize + ReLU
    -> single store.  The conv tile never leaves VMEM."""
    acc = jnp.dot(x_ref[...], w_ref[...], preferred_element_type=jnp.float32)
    inv_m = 1.0 / m_rows
    mean = jnp.sum(acc, axis=0, keepdims=True) * inv_m                  # (1, Cout)
    var = jnp.maximum(
        jnp.sum(acc * acc, axis=0, keepdims=True) * inv_m - mean * mean, 0.0)
    scale = g_ref[...] * lax.rsqrt(var + BN_EPS)                        # (1, Cout)
    shift = b_ref[...] - mean * scale
    o_ref[...] = jnp.maximum(acc * scale + shift, 0.0).astype(o_ref.dtype)


def conv_bn_relu(x_nhwc, w_oihw, conv_b, gamma, beta, padding,
                 out_dtype=jnp.bfloat16):
    """One Conv(3x3, stride 1) + BN(batch stats) + ReLU block. x_nhwc: (N,H,W,Cin)."""
    del conv_b  # cancelled exactly by the BN batch-mean subtraction
    if padding:
        x_nhwc = jnp.pad(
            x_nhwc, ((0, 0), (padding, padding), (padding, padding), (0, 0)))
    N, H, W, Cin = x_nhwc.shape
    Cout = w_oihw.shape[0]
    Ho, Wo = H - 2, W - 2
    M = N * Ho * Wo
    K = 9 * Cin

    # im2col slab (M, 9*Cin) in bf16 (channel-stacked taps, kh-major/kw/ci order).
    cols = [x_nhwc[:, kh:kh + Ho, kw:kw + Wo, :]
            for kh in range(3) for kw in range(3)]
    slab = jnp.concatenate(cols, axis=-1).reshape(M, K).astype(jnp.bfloat16)
    # PyTorch conv weight (Cout, Cin, 3, 3) -> (9*Cin, Cout), same tap ordering.
    w = jnp.transpose(w_oihw, (2, 3, 1, 0)).reshape(K, Cout).astype(jnp.bfloat16)

    out_bytes = M * Cout * jnp.dtype(out_dtype).itemsize
    out_flat = pl.pallas_call(
        functools.partial(_fused_conv_bn_relu_kernel, m_rows=float(M)),
        out_shape=jax.ShapeDtypeStruct((M, Cout), out_dtype),
        in_specs=[pl.BlockSpec(memory_space=pltpu.MemorySpace.VMEM)] * 4,
        out_specs=pl.BlockSpec(memory_space=pltpu.MemorySpace.VMEM),
        compiler_params=pltpu.CompilerParams(vmem_limit_bytes=VMEM_LIMIT),
        cost_estimate=pl.CostEstimate(
            flops=2 * M * K * Cout + 8 * M * Cout,
            transcendentals=Cout,
            bytes_accessed=(M * K * 2 + K * Cout * 2 + 2 * Cout * 4 + out_bytes)),
    )(slab, w, gamma.reshape(1, Cout), beta.reshape(1, Cout))

    return out_flat.reshape(N, Ho, Wo, Cout)


def maxpool2(x_nhwc):
    """MaxPool2d(kernel=2, stride=2), floor mode (drops odd trailing row/col)."""
    N, H, W, C = x_nhwc.shape
    Hf, Wf = H // 2, W // 2
    x = x_nhwc[:, :Hf * 2, :Wf * 2, :].reshape(N, Hf, 2, Wf, 2, C)
    return jnp.max(x, axis=(2, 4))


def cnn_encoder_forward(x_nchw, params):
    """Matches CNNEncoder.forward. Input/output NCHW (PyTorch convention)."""
    x = jnp.transpose(x_nchw, (0, 2, 3, 1))  # NCHW -> NHWC for the kernels
    x = maxpool2(conv_bn_relu(x, *params["layer1"], padding=0))
    x = maxpool2(conv_bn_relu(x, *params["layer2"], padding=0))
    x = conv_bn_relu(x, *params["layer3"], padding=1)
    x = conv_bn_relu(x, *params["layer4"], padding=1, out_dtype=jnp.float32)
    return jnp.transpose(x, (0, 3, 1, 2))    # NHWC -> NCHW


def init_params(key):
    """Deterministic synthetic parameters with the module's shapes."""
    params = {}
    cins = {"layer1": 3, "layer2": 64, "layer3": 64, "layer4": 64}
    for name, cin in cins.items():
        key, kw, kb = jax.random.split(key, 3)
        fan_in = cin * 3 * 3
        bound = 1.0 / (fan_in ** 0.5)
        w = jax.random.uniform(kw, (64, cin, 3, 3), jnp.float32, -bound, bound)
        b = jax.random.uniform(kb, (64,), jnp.float32, -bound, bound)
        gamma = jnp.ones((64,), jnp.float32)   # BN affine weight init
        beta = jnp.zeros((64,), jnp.float32)   # BN affine bias init
        params[name] = (w, b, gamma, beta)
    return params


# ---------------- pure-JAX f32 reference (for correctness check) ----------------
def _ref_block(x, w, b, g, beta, padding):
    y = lax.conv_general_dilated(
        x, jnp.transpose(w, (2, 3, 1, 0)), window_strides=(1, 1),
        padding=[(padding, padding)] * 2,
        dimension_numbers=("NHWC", "HWIO", "NHWC"))
    y = y + b.reshape(1, 1, 1, -1)
    mean = jnp.mean(y, axis=(0, 1, 2), keepdims=True)
    var = jnp.mean((y - mean) ** 2, axis=(0, 1, 2), keepdims=True)
    y = (y - mean) * lax.rsqrt(var + BN_EPS)
    y = y * g.reshape(1, 1, 1, -1) + beta.reshape(1, 1, 1, -1)
    return jnp.maximum(y, 0.0)


def _ref_forward(x_nchw, params):
    x = jnp.transpose(x_nchw, (0, 2, 3, 1))
    x = maxpool2(_ref_block(x, *params["layer1"], padding=0))
    x = maxpool2(_ref_block(x, *params["layer2"], padding=0))
    x = _ref_block(x, *params["layer3"], padding=1)
    x = _ref_block(x, *params["layer4"], padding=1)
    return jnp.transpose(x, (0, 3, 1, 2))


if __name__ == "__main__":
    key = jax.random.PRNGKey(0)
    kx, kp = jax.random.split(key)
    x = jax.random.normal(kx, (2, 3, 16, 16), jnp.float32)   # NCHW like PyTorch
    params = init_params(kp)

    fwd = jax.jit(lambda inp: cnn_encoder_forward(inp, params))
    out = fwd(x)
    jax.block_until_ready(out)

    # 16x16 -> conv(p=0) 14 -> pool 7 -> conv(p=0) 5 -> pool 2 -> p=1 convs keep 2
    assert out.shape == (2, 64, 2, 2), out.shape

    ref = _ref_forward(x, params)
    jax.block_until_ready(ref)
    # Tolerance reflects bf16 MXU inputs + bf16 inter-layer activations vs the f32
    # reference, compounded through 4 BatchNorm'd conv layers (review-endorsed).
    max_err = float(jnp.max(jnp.abs(out - ref)))
    assert jnp.allclose(out, ref, rtol=1e-1, atol=1e-1), max_err

    print("KERNEL_OK")
</pallas_src>

<mosaic_0001>
module attributes {stable_mosaic.version = 11 : i64} {
  func.func @_fused_conv_bn_relu_kernel(%arg0: memref<392x27xbf16, #tpu.memory_space<vmem>>, %arg1: memref<27x64xbf16, #tpu.memory_space<vmem>>, %arg2: memref<1x64xf32, #tpu.memory_space<vmem>>, %arg3: memref<1x64xf32, #tpu.memory_space<vmem>>, %arg4: memref<392x64xbf16, #tpu.memory_space<vmem>>) attributes {dimension_semantics = [], scalar_prefetch = 0 : i64, scratch_operands = 0 : i64, tpu.core_type = #tpu.core_type<tc>} {
    %c0 = arith.constant 0 : index
    %c0_0 = arith.constant 0 : index
    %0 = vector.load %arg0[%c0, %c0_0] : memref<392x27xbf16, #tpu.memory_space<vmem>>, vector<392x27xbf16>
    %c0_1 = arith.constant 0 : index
    %c0_2 = arith.constant 0 : index
    %1 = vector.load %arg1[%c0_1, %c0_2] : memref<27x64xbf16, #tpu.memory_space<vmem>>, vector<27x64xbf16>
    %cst = arith.constant dense<0.000000e+00> : vector<392x64xf32>
    %2 = tpu.matmul %0, %1, %cst {dimension_numbers = #tpu.dot_dimension_numbers<[1], [0], [0], [1], [0, 0, 1, 1], [], []>} : vector<392x27xbf16>, vector<27x64xbf16>, vector<392x64xf32> -> vector<392x64xf32>
    %cst_3 = arith.constant dense<0.000000e+00> : vector<64xf32>
    %3 = vector.multi_reduction <add>, %2, %cst_3 [0] : vector<392x64xf32> to vector<64xf32>
    %4 = vector.shape_cast %3 : vector<64xf32> to vector<1x64xf32>
    %cst_4 = arith.constant 0.00255102036 : f32
    %5 = vector.broadcast %cst_4 : f32 to vector<1x64xf32>
    %6 = arith.mulf %4, %5 : vector<1x64xf32>
    %7 = arith.mulf %2, %2 : vector<392x64xf32>
    %cst_5 = arith.constant dense<0.000000e+00> : vector<64xf32>
    %8 = vector.multi_reduction <add>, %7, %cst_5 [0] : vector<392x64xf32> to vector<64xf32>
    %9 = vector.shape_cast %8 : vector<64xf32> to vector<1x64xf32>
    %cst_6 = arith.constant 0.00255102036 : f32
    %10 = vector.broadcast %cst_6 : f32 to vector<1x64xf32>
    %11 = arith.mulf %9, %10 : vector<1x64xf32>
    %12 = arith.mulf %6, %6 : vector<1x64xf32>
    %13 = arith.subf %11, %12 : vector<1x64xf32>
    %cst_7 = arith.constant 0.000000e+00 : f32
    %14 = vector.broadcast %cst_7 : f32 to vector<1x64xf32>
    %15 = arith.maximumf %13, %14 : vector<1x64xf32>
    %c0_8 = arith.constant 0 : index
    %c0_9 = arith.constant 0 : index
    %16 = vector.load %arg2[%c0_8, %c0_9] : memref<1x64xf32, #tpu.memory_space<vmem>>, vector<1x64xf32>
    %cst_10 = arith.constant 9.99999974E-6 : f32
    %17 = vector.broadcast %cst_10 : f32 to vector<1x64xf32>
    %18 = arith.addf %15, %17 : vector<1x64xf32>
    %19 = math.rsqrt %18 : vector<1x64xf32>
    %20 = arith.mulf %16, %19 : vector<1x64xf32>
    %c0_11 = arith.constant 0 : index
    %c0_12 = arith.constant 0 : index
    %21 = vector.load %arg3[%c0_11, %c0_12] : memref<1x64xf32, #tpu.memory_space<vmem>>, vector<1x64xf32>
    %22 = arith.mulf %6, %20 : vector<1x64xf32>
    %23 = arith.subf %21, %22 : vector<1x64xf32>
    %24 = vector.broadcast %20 : vector<1x64xf32> to vector<392x64xf32>
    %25 = arith.mulf %2, %24 : vector<392x64xf32>
    %26 = vector.broadcast %23 : vector<1x64xf32> to vector<392x64xf32>
    %27 = arith.addf %25, %26 : vector<392x64xf32>
    %cst_13 = arith.constant 0.000000e+00 : f32
    %28 = vector.broadcast %cst_13 : f32 to vector<392x64xf32>
    %29 = arith.maximumf %27, %28 : vector<392x64xf32>
    %30 = arith.truncf %29 : vector<392x64xf32> to vector<392x64xbf16>
    %c0_14 = arith.constant 0 : index
    %c0_15 = arith.constant 0 : index
    %31 = vector.load %arg4[%c0_14, %c0_15] : memref<392x64xbf16, #tpu.memory_space<vmem>>, vector<392x64xbf16>
    tpu.vector_store %arg4[%c0_14, %c0_15], %30 {strides = array<i32>} : memref<392x64xbf16, #tpu.memory_space<vmem>>, vector<392x64xbf16>,
    return
  }
}

module attributes {stable_mosaic.version = 11 : i64} {
  func.func @_fused_conv_bn_relu_kernel(%arg0: memref<50x576xbf16, #tpu.memory_space<vmem>>, %arg1: memref<576x64xbf16, #tpu.memory_space<vmem>>, %arg2: memref<1x64xf32, #tpu.memory_space<vmem>>, %arg3: memref<1x64xf32, #tpu.memory_space<vmem>>, %arg4: memref<50x64xbf16, #tpu.memory_space<vmem>>) attributes {dimension_semantics = [], scalar_prefetch = 0 : i64, scratch_operands = 0 : i64, tpu.core_type = #tpu.core_type<tc>} {
    %c0 = arith.constant 0 : index
    %c0_0 = arith.constant 0 : index
    %0 = vector.load %arg0[%c0, %c0_0] : memref<50x576xbf16, #tpu.memory_space<vmem>>, vector<50x576xbf16>
    %c0_1 = arith.constant 0 : index
    %c0_2 = arith.constant 0 : index
    %1 = vector.load %arg1[%c0_1, %c0_2] : memref<576x64xbf16, #tpu.memory_space<vmem>>, vector<576x64xbf16>
    %cst = arith.constant dense<0.000000e+00> : vector<50x64xf32>
    %2 = tpu.matmul %0, %1, %cst {dimension_numbers = #tpu.dot_dimension_numbers<[1], [0], [0], [1], [0, 0, 1, 1], [], []>} : vector<50x576xbf16>, vector<576x64xbf16>, vector<50x64xf32> -> vector<50x64xf32>
    %cst_3 = arith.constant dense<0.000000e+00> : vector<64xf32>
    %3 = vector.multi_reduction <add>, %2, %cst_3 [0] : vector<50x64xf32> to vector<64xf32>
    %4 = vector.shape_cast %3 : vector<64xf32> to vector<1x64xf32>
    %cst_4 = arith.constant 2.000000e-02 : f32
    %5 = vector.broadcast %cst_4 : f32 to vector<1x64xf32>
    %6 = arith.mulf %4, %5 : vector<1x64xf32>
    %7 = arith.mulf %2, %2 : vector<50x64xf32>
    %cst_5 = arith.constant dense<0.000000e+00> : vector<64xf32>
    %8 = vector.multi_reduction <add>, %7, %cst_5 [0] : vector<50x64xf32> to vector<64xf32>
    %9 = vector.shape_cast %8 : vector<64xf32> to vector<1x64xf32>
    %cst_6 = arith.constant 2.000000e-02 : f32
    %10 = vector.broadcast %cst_6 : f32 to vector<1x64xf32>
    %11 = arith.mulf %9, %10 : vector<1x64xf32>
    %12 = arith.mulf %6, %6 : vector<1x64xf32>
    %13 = arith.subf %11, %12 : vector<1x64xf32>
    %cst_7 = arith.constant 0.000000e+00 : f32
    %14 = vector.broadcast %cst_7 : f32 to vector<1x64xf32>
    %15 = arith.maximumf %13, %14 : vector<1x64xf32>
    %c0_8 = arith.constant 0 : index
    %c0_9 = arith.constant 0 : index
    %16 = vector.load %arg2[%c0_8, %c0_9] : memref<1x64xf32, #tpu.memory_space<vmem>>, vector<1x64xf32>
    %cst_10 = arith.constant 9.99999974E-6 : f32
    %17 = vector.broadcast %cst_10 : f32 to vector<1x64xf32>
    %18 = arith.addf %15, %17 : vector<1x64xf32>
    %19 = math.rsqrt %18 : vector<1x64xf32>
    %20 = arith.mulf %16, %19 : vector<1x64xf32>
    %c0_11 = arith.constant 0 : index
    %c0_12 = arith.constant 0 : index
    %21 = vector.load %arg3[%c0_11, %c0_12] : memref<1x64xf32, #tpu.memory_space<vmem>>, vector<1x64xf32>
    %22 = arith.mulf %6, %20 : vector<1x64xf32>
    %23 = arith.subf %21, %22 : vector<1x64xf32>
    %24 = vector.broadcast %20 : vector<1x64xf32> to vector<50x64xf32>
    %25 = arith.mulf %2, %24 : vector<50x64xf32>
    %26 = vector.broadcast %23 : vector<1x64xf32> to vector<50x64xf32>
    %27 = arith.addf %25, %26 : vector<50x64xf32>
    %cst_13 = arith.constant 0.000000e+00 : f32
    %28 = vector.broadcast %cst_13 : f32 to vector<50x64xf32>
    %29 = arith.maximumf %27, %28 : vector<50x64xf32>
    %30 = arith.truncf %29 : vector<50x64xf32> to vector<50x64xbf16>
    %c0_14 = arith.constant 0 : index
    %c0_15 = arith.constant 0 : index
    %31 = vector.load %arg4[%c0_14, %c0_15] : memref<50x64xbf16, #tpu.memory_space<vmem>>, vector<50x64xbf16>
    tpu.vector_store %arg4[%c0_14, %c0_15], %30 {strides = array<i32>} : memref<50x64xbf16, #tpu.memory_space<vmem>>, vector<50x64xbf16>,
    return
  }
}

module attributes {stable_mosaic.version = 11 : i64} {
  func.func @_fused_conv_bn_relu_kernel(%arg0: memref<8x576xbf16, #tpu.memory_space<vmem>>, %arg1: memref<576x64xbf16, #tpu.memory_space<vmem>>, %arg2: memref<1x64xf32, #tpu.memory_space<vmem>>, %arg3: memref<1x64xf32, #tpu.memory_space<vmem>>, %arg4: memref<8x64xbf16, #tpu.memory_space<vmem>>) attributes {dimension_semantics = [], scalar_prefetch = 0 : i64, scratch_operands = 0 : i64, tpu.core_type = #tpu.core_type<tc>} {
    %c0 = arith.constant 0 : index
    %c0_0 = arith.constant 0 : index
    %0 = vector.load %arg0[%c0, %c0_0] : memref<8x576xbf16, #tpu.memory_space<vmem>>, vector<8x576xbf16>
    %c0_1 = arith.constant 0 : index
    %c0_2 = arith.constant 0 : index
    %1 = vector.load %arg1[%c0_1, %c0_2] : memref<576x64xbf16, #tpu.memory_space<vmem>>, vector<576x64xbf16>
    %cst = arith.constant dense<0.000000e+00> : vector<8x64xf32>
    %2 = tpu.matmul %0, %1, %cst {dimension_numbers = #tpu.dot_dimension_numbers<[1], [0], [0], [1], [0, 0, 1, 1], [], []>} : vector<8x576xbf16>, vector<576x64xbf16>, vector<8x64xf32> -> vector<8x64xf32>
    %cst_3 = arith.constant dense<0.000000e+00> : vector<64xf32>
    %3 = vector.multi_reduction <add>, %2, %cst_3 [0] : vector<8x64xf32> to vector<64xf32>
    %4 = vector.shape_cast %3 : vector<64xf32> to vector<1x64xf32>
    %cst_4 = arith.constant 1.250000e-01 : f32
    %5 = vector.broadcast %cst_4 : f32 to vector<1x64xf32>
    %6 = arith.mulf %4, %5 : vector<1x64xf32>
    %7 = arith.mulf %2, %2 : vector<8x64xf32>
    %cst_5 = arith.constant dense<0.000000e+00> : vector<64xf32>
    %8 = vector.multi_reduction <add>, %7, %cst_5 [0] : vector<8x64xf32> to vector<64xf32>
    %9 = vector.shape_cast %8 : vector<64xf32> to vector<1x64xf32>
    %cst_6 = arith.constant 1.250000e-01 : f32
    %10 = vector.broadcast %cst_6 : f32 to vector<1x64xf32>
    %11 = arith.mulf %9, %10 : vector<1x64xf32>
    %12 = arith.mulf %6, %6 : vector<1x64xf32>
    %13 = arith.subf %11, %12 : vector<1x64xf32>
    %cst_7 = arith.constant 0.000000e+00 : f32
    %14 = vector.broadcast %cst_7 : f32 to vector<1x64xf32>
    %15 = arith.maximumf %13, %14 : vector<1x64xf32>
    %c0_8 = arith.constant 0 : index
    %c0_9 = arith.constant 0 : index
    %16 = vector.load %arg2[%c0_8, %c0_9] : memref<1x64xf32, #tpu.memory_space<vmem>>, vector<1x64xf32>
    %cst_10 = arith.constant 9.99999974E-6 : f32
    %17 = vector.broadcast %cst_10 : f32 to vector<1x64xf32>
    %18 = arith.addf %15, %17 : vector<1x64xf32>
    %19 = math.rsqrt %18 : vector<1x64xf32>
    %20 = arith.mulf %16, %19 : vector<1x64xf32>
    %c0_11 = arith.constant 0 : index
    %c0_12 = arith.constant 0 : index
    %21 = vector.load %arg3[%c0_11, %c0_12] : memref<1x64xf32, #tpu.memory_space<vmem>>, vector<1x64xf32>
    %22 = arith.mulf %6, %20 : vector<1x64xf32>
    %23 = arith.subf %21, %22 : vector<1x64xf32>
    %24 = vector.broadcast %20 : vector<1x64xf32> to vector<8x64xf32>
    %25 = arith.mulf %2, %24 : vector<8x64xf32>
    %26 = vector.broadcast %23 : vector<1x64xf32> to vector<8x64xf32>
    %27 = arith.addf %25, %26 : vector<8x64xf32>
    %cst_13 = arith.constant 0.000000e+00 : f32
    %28 = vector.broadcast %cst_13 : f32 to vector<8x64xf32>
    %29 = arith.maximumf %27, %28 : vector<8x64xf32>
    %30 = arith.truncf %29 : vector<8x64xf32> to vector<8x64xbf16>
    %c0_14 = arith.constant 0 : index
    %c0_15 = arith.constant 0 : index
    %31 = vector.load %arg4[%c0_14, %c0_15] : memref<8x64xbf16, #tpu.memory_space<vmem>>, vector<8x64xbf16>
    tpu.vector_store %arg4[%c0_14, %c0_15], %30 {strides = array<i32>} : memref<8x64xbf16, #tpu.memory_space<vmem>>, vector<8x64xbf16>,
    return
  }
}

module attributes {stable_mosaic.version = 11 : i64} {
  func.func @_fused_conv_bn_relu_kernel(%arg0: memref<8x576xbf16, #tpu.memory_space<vmem>>, %arg1: memref<576x64xbf16, #tpu.memory_space<vmem>>, %arg2: memref<1x64xf32, #tpu.memory_space<vmem>>, %arg3: memref<1x64xf32, #tpu.memory_space<vmem>>, %arg4: memref<8x64xf32, #tpu.memory_space<vmem>>) attributes {dimension_semantics = [], scalar_prefetch = 0 : i64, scratch_operands = 0 : i64, tpu.core_type = #tpu.core_type<tc>} {
    %c0 = arith.constant 0 : index
    %c0_0 = arith.constant 0 : index
    %0 = vector.load %arg0[%c0, %c0_0] : memref<8x576xbf16, #tpu.memory_space<vmem>>, vector<8x576xbf16>
    %c0_1 = arith.constant 0 : index
    %c0_2 = arith.constant 0 : index
    %1 = vector.load %arg1[%c0_1, %c0_2] : memref<576x64xbf16, #tpu.memory_space<vmem>>, vector<576x64xbf16>
    %cst = arith.constant dense<0.000000e+00> : vector<8x64xf32>
    %2 = tpu.matmul %0, %1, %cst {dimension_numbers = #tpu.dot_dimension_numbers<[1], [0], [0], [1], [0, 0, 1, 1], [], []>} : vector<8x576xbf16>, vector<576x64xbf16>, vector<8x64xf32> -> vector<8x64xf32>
    %cst_3 = arith.constant dense<0.000000e+00> : vector<64xf32>
    %3 = vector.multi_reduction <add>, %2, %cst_3 [0] : vector<8x64xf32> to vector<64xf32>
    %4 = vector.shape_cast %3 : vector<64xf32> to vector<1x64xf32>
    %cst_4 = arith.constant 1.250000e-01 : f32
    %5 = vector.broadcast %cst_4 : f32 to vector<1x64xf32>
    %6 = arith.mulf %4, %5 : vector<1x64xf32>
    %7 = arith.mulf %2, %2 : vector<8x64xf32>
    %cst_5 = arith.constant dense<0.000000e+00> : vector<64xf32>
    %8 = vector.multi_reduction <add>, %7, %cst_5 [0] : vector<8x64xf32> to vector<64xf32>
    %9 = vector.shape_cast %8 : vector<64xf32> to vector<1x64xf32>
    %cst_6 = arith.constant 1.250000e-01 : f32
    %10 = vector.broadcast %cst_6 : f32 to vector<1x64xf32>
    %11 = arith.mulf %9, %10 : vector<1x64xf32>
    %12 = arith.mulf %6, %6 : vector<1x64xf32>
    %13 = arith.subf %11, %12 : vector<1x64xf32>
    %cst_7 = arith.constant 0.000000e+00 : f32
    %14 = vector.broadcast %cst_7 : f32 to vector<1x64xf32>
    %15 = arith.maximumf %13, %14 : vector<1x64xf32>
    %c0_8 = arith.constant 0 : index
    %c0_9 = arith.constant 0 : index
    %16 = vector.load %arg2[%c0_8, %c0_9] : memref<1x64xf32, #tpu.memory_space<vmem>>, vector<1x64xf32>
    %cst_10 = arith.constant 9.99999974E-6 : f32
    %17 = vector.broadcast %cst_10 : f32 to vector<1x64xf32>
    %18 = arith.addf %15, %17 : vector<1x64xf32>
    %19 = math.rsqrt %18 : vector<1x64xf32>
    %20 = arith.mulf %16, %19 : vector<1x64xf32>
    %c0_11 = arith.constant 0 : index
    %c0_12 = arith.constant 0 : index
    %21 = vector.load %arg3[%c0_11, %c0_12] : memref<1x64xf32, #tpu.memory_space<vmem>>, vector<1x64xf32>
    %22 = arith.mulf %6, %20 : vector<1x64xf32>
    %23 = arith.subf %21, %22 : vector<1x64xf32>
    %24 = vector.broadcast %20 : vector<1x64xf32> to vector<8x64xf32>
    %25 = arith.mulf %2, %24 : vector<8x64xf32>
    %26 = vector.broadcast %23 : vector<1x64xf32> to vector<8x64xf32>
    %27 = arith.addf %25, %26 : vector<8x64xf32>
    %cst_13 = arith.constant 0.000000e+00 : f32
    %28 = vector.broadcast %cst_13 : f32 to vector<8x64xf32>
    %29 = arith.maximumf %27, %28 : vector<8x64xf32>
    %c0_14 = arith.constant 0 : index
    %c0_15 = arith.constant 0 : index
    %30 = vector.load %arg4[%c0_14, %c0_15] : memref<8x64xf32, #tpu.memory_space<vmem>>, vector<8x64xf32>
    tpu.vector_store %arg4[%c0_14, %c0_15], %29 {strides = array<i32>} : memref<8x64xf32, #tpu.memory_space<vmem>>, vector<8x64xf32>,
    return
  }
}

</mosaic_0001>

<bundles_post_ra>
// kernel: _lambda_.4
= control target key start
LH: loop header
LB: loop body
LE: loop exit
PB: predicated region body
PF: predicated region fallthrough
CT: control target
= control target key end

     0   :  { %vm281_vm0 = vcmask 1044480   ;;  %vm282_vm1 = vcmask 1045504   ;;  %v1515_v0 = vmov 0.0   ;;  %v1516_v2 = vmov 65535   ;;  %s2525_s1 = inlined_call_operand.vmem [shape: bf16[27,64], index: 1, kind: input, shape index: {}]   ;;  %s2526_s0 = inlined_call_operand.vmem [shape: bf16[392,27], index: 0, kind: input, shape index: {}]   ;;  %s2527_s2 = inlined_call_operand.vmem [shape: f32[1,64], index: 2, kind: input, shape index: {}]   ;;  %s2528_s3 = inlined_call_operand.vmem [shape: f32[1,64], index: 3, kind: input, shape index: {}]   ;;  %s2529_s4 = inlined_call_operand.vmem [shape: bf16[392,64], index: 4, kind: output, shape index: {}]  }
   0x1   :  { %1375 = vmatprep.subr.bf16.mxu0 %v1515_v0  ;;  %v1486_v1 = vld [vmem:[%s2525_s1] sm:$0xff]   ;;  %v283_v3 = vsel %vm281_vm0, 4294967295, %v1516_v2  ;;  %1479 = vmatprep.subr.bf16.mxu1 %v1515_v0  ;;  %v1487_v4 = vld [vmem:[%s2525_s1 + $0x8] sm:$0x3f]   ;;  %vm1517_vm2 = vmmov 0   ;;  %vm205_vm3 = vcmask 220160  }
   0x2   :  { %1376 = vmatpush3.bf16.msra.mxu0 %v1486_v1  ;;  %v284_v5 = vsel %vm282_vm1, %v283_v3, 0  ;;  %1481 = vmatpush3.bf16.msra.mxu1 %v1486_v1  ;;  %v1488_v7 = vld [vmem:[%s2526_s0] sm:$0xff]   ;;  %v1495_v8 = vld [vmem:[%s2526_s0 + $0x68] sm:$0xff]   ;;  %v1497_v10 = vld [vmem:[%s2526_s0 + $0x70] sm:$0xff]   ;;  %vm520_vm4 = vcmask 523264   ;;  %vm1144_vm5 = vcmask 519168  }
   0x3   :  { %1377 = vmatprep.subr.bf16.mxu0 %v1515_v0  ;;  %v286_v6 = vand.u32 %v1487_v4, %v284_v5  ;;  %1379 = vmatprep.mubr.msk.bf16.mxu0 %vm1517_vm2, %v1515_v0  ;;  %v1489_v9 = vld [vmem:[%s2526_s0 + $0x8] sm:$0xff]   ;;  %v1490_v11 = vld [vmem:[%s2526_s0 + $0x10] sm:$0xff]   ;;  %v1499_v12 = vld [vmem:[%s2526_s0 + $0x78] sm:$0xff]  }
   0x4   :  { %1480 = vmatprep.subr.bf16.mxu1 %v1515_v0  ;;  %1431 = vmatprep.mubr.msk.bf16.mxu1 %vm1517_vm2, %v1515_v0  ;;  %v1491_v13 = vld [vmem:[%s2526_s0 + $0x18] sm:$0xff]   ;;  %v1501_v14 = vld [vmem:[%s2526_s0 + $0x80] sm:$0xff]   ;;  %v1503_v16 = vld [vmem:[%s2526_s0 + $0x88] sm:$0xff]  }
   0x5   :  { %v1492_v15 = vld [vmem:[%s2526_s0 + $0x20] sm:$0xff]   ;;  %v1493_v17 = vld [vmem:[%s2526_s0 + $0x28] sm:$0xff]   ;;  %v1505_v18 = vld [vmem:[%s2526_s0 + $0x90] sm:$0xff]  }
   0x6   :  { %1378 = vmatpush3.bf16.msra.mxu0 %v286_v6  ;;  %1482 = vmatpush3.bf16.msra.mxu1 %v286_v6  ;;  %v1494_v19 = vld [vmem:[%s2526_s0 + $0x30] sm:$0xff]   ;;  %v1507_v20 = vld [vmem:[%s2526_s0 + $0x98] sm:$0xff]   ;;  %v1508_v22 = vld [vmem:[%s2526_s0 + $0xa0] sm:$0xff]  }
   0x7   :  { %v1496_v21 = vld [vmem:[%s2526_s0 + $0x38] sm:$0xff]   ;;  %v1498_v23 = vld [vmem:[%s2526_s0 + $0x40] sm:$0xff]   ;;  %v1509_v24 = vld [vmem:[%s2526_s0 + $0xa8] sm:$0xff]  }
   0x8   :  { %v1500_v25 = vld [vmem:[%s2526_s0 + $0x48] sm:$0xff]   ;;  %v1510_v26 = vld [vmem:[%s2526_s0 + $0xb0] sm:$0xff]   ;;  %v1511_v28 = vld [vmem:[%s2526_s0 + $0xb8] sm:$0xff]  }
   0x9   :  { %1380 = vmatmul.mubr.msk.bf16.vlgmr.msra.gmra.mrb[0].mxu0 %vm205_vm3, %v1488_v7  ;;  %1432 = vmatmul.mubr.msk.bf16.vlgmr.msra.gmra.mrb[0].mxu1 %vm205_vm3, %v1495_v8  ;;  %v1502_v27 = vld [vmem:[%s2526_s0 + $0x50] sm:$0xff]   ;;  %v1504_v29 = vld [vmem:[%s2526_s0 + $0x58] sm:$0xff]   ;;  %v1512_v30 = vld [vmem:[%s2526_s0 + $0xc0] ss:$0 sps:$4 sm:$0xff]  }
   0xa   :  { %1383 = vmatprep.mubr.msk.bf16.mxu0 %vm1517_vm2, %v1515_v0  ;;  %1435 = vmatprep.mubr.msk.bf16.mxu1 %vm1517_vm2, %v1515_v0  ;;  %v1506_v31 = vld [vmem:[%s2526_s0 + $0x60] sm:$0xff]  }
  0x11   :  { %1384 = vmatmul.mubr.msk.bf16.gmra.mrb[4].mxu0 %vm205_vm3, %v1489_v9  ;;  %1436 = vmatmul.mubr.msk.bf16.gmra.mrb[4].mxu1 %vm205_vm3, %v1497_v10 }
  0x12   :  { %1387 = vmatprep.mubr.msk.bf16.mxu0 %vm1517_vm2, %v1515_v0  ;;  %1439 = vmatprep.mubr.msk.bf16.mxu1 %vm1517_vm2, %v1515_v0 }
  0x19   :  { %1388 = vmatmul.mubr.msk.bf16.gmra.mrb[8].mxu0 %vm205_vm3, %v1490_v11  ;;  %1440 = vmatmul.mubr.msk.bf16.gmra.mrb[8].mxu1 %vm205_vm3, %v1499_v12 }
  0x1a   :  { %1391 = vmatprep.mubr.msk.bf16.mxu0 %vm1517_vm2, %v1515_v0  ;;  %1443 = vmatprep.mubr.msk.bf16.mxu1 %vm1517_vm2, %v1515_v0 }
  0x21   :  { %1392 = vmatmul.mubr.msk.bf16.gmra.mrb[12].mxu0 %vm205_vm3, %v1491_v13  ;;  %1444 = vmatmul.mubr.msk.bf16.gmra.mrb[12].mxu1 %vm205_vm3, %v1501_v14 }
  0x22   :  { %1395 = vmatprep.mubr.msk.bf16.mxu0 %vm1517_vm2, %v1515_v0  ;;  %1447 = vmatprep.mubr.msk.bf16.mxu1 %vm1517_vm2, %v1515_v0 }
  0x29   :  { %1396 = vmatmul.mubr.msk.bf16.gmra.mrb[16].mxu0 %vm205_vm3, %v1492_v15  ;;  %1448 = vmatmul.mubr.msk.bf16.gmra.mrb[16].mxu1 %vm205_vm3, %v1503_v16 }
  0x2a   :  { %1399 = vmatprep.mubr.msk.bf16.mxu0 %vm1517_vm2, %v1515_v0  ;;  %1451 = vmatprep.mubr.msk.bf16.mxu1 %vm1517_vm2, %v1515_v0 }
  0x31   :  { %1400 = vmatmul.mubr.msk.bf16.gmra.mrb[20].mxu0 %vm205_vm3, %v1493_v17  ;;  %1452 = vmatmul.mubr.msk.bf16.gmra.mrb[20].mxu1 %vm205_vm3, %v1505_v18 }
  0x32   :  { %1403 = vmatprep.mubr.msk.bf16.mxu0 %vm1517_vm2, %v1515_v0  ;;  %1455 = vmatprep.mubr.msk.bf16.mxu1 %vm1517_vm2, %v1515_v0 }
  0x39   :  { %1404 = vmatmul.mubr.msk.bf16.gmra.mrb[24].mxu0 %vm205_vm3, %v1494_v19  ;;  %1456 = vmatmul.mubr.msk.bf16.gmra.mrb[24].mxu1 %vm205_vm3, %v1507_v20 }
  0x3a   :  { %1407 = vmatprep.mubr.msk.bf16.mxu0 %vm1517_vm2, %v1515_v0  ;;  %1459 = vmatprep.mubr.msk.bf16.mxu1 %vm1517_vm2, %v1515_v0 }
  0x41   :  { %1408 = vmatmul.mubr.msk.bf16.gmra.mrb[28].mxu0 %vm205_vm3, %v1496_v21  ;;  %1460 = vmatmul.mubr.msk.bf16.gmra.mrb[28].mxu1 %vm205_vm3, %v1508_v22 }
  0x42   :  { %1411 = vmatprep.mubr.msk.bf16.mxu0 %vm1517_vm2, %v1515_v0  ;;  %1463 = vmatprep.mubr.msk.bf16.mxu1 %vm1517_vm2, %v1515_v0 }
  0x49   :  { %1412 = vmatmul.mubr.msk.bf16.gmra.mrb[32].mxu0 %vm205_vm3, %v1498_v23  ;;  %1464 = vmatmul.mubr.msk.bf16.gmra.mrb[32].mxu1 %vm205_vm3, %v1509_v24 }
  0x4a   :  { %1415 = vmatprep.mubr.msk.bf16.mxu0 %vm1517_vm2, %v1515_v0  ;;  %1467 = vmatprep.mubr.msk.bf16.mxu1 %vm1517_vm2, %v1515_v0 }
  0x51   :  { %1416 = vmatmul.mubr.msk.bf16.gmra.mrb[36].mxu0 %vm205_vm3, %v1500_v25  ;;  %1468 = vmatmul.mubr.msk.bf16.gmra.mrb[36].mxu1 %vm205_vm3, %v1510_v26 }
  0x52   :  { %1419 = vmatprep.mubr.msk.bf16.mxu0 %vm1517_vm2, %v1515_v0  ;;  %1471 = vmatprep.mubr.msk.bf16.mxu1 %vm1517_vm2, %v1515_v0 }
  0x59   :  { %1420 = vmatmul.mubr.msk.bf16.gmra.mrb[40].mxu0 %vm205_vm3, %v1502_v27  ;;  %1472 = vmatmul.mubr.msk.bf16.gmra.mrb[40].mxu1 %vm205_vm3, %v1511_v28 }
  0x5a   :  { %1423 = vmatprep.mubr.msk.bf16.mxu0 %vm1517_vm2, %v1515_v0  ;;  %1475 = vmatprep.mubr.msk.bf16.mxu1 %vm1517_vm2, %v1515_v0 }
  0x61   :  { %1424 = vmatmul.mubr.msk.bf16.gmra.mrb[44].mxu0 %vm205_vm3, %v1504_v29  ;;  %1476 = vmatmul.mubr.msk.bf16.gmra.mrb[44].mxu1 %vm205_vm3, %v1512_v30 }
  0x62   :  { %1427 = vmatprep.mubr.msk.bf16.mxu0 %vm1517_vm2, %v1515_v0 }
  0x69   :  { %1428 = vmatmul.mubr.msk.bf16.gmra.mrb[48].mxu0 %vm205_vm3, %v1506_v31 }
  0xdc   :  { %v1703_v32 = vpop.f32.mrb[0].mxu0  ;;  %v1715_v40 = vpop.f32.mrb[0].mxu1 }
  0xdd   :  { %v625_v33 = vmul.f32 %v1703_v32, %v1703_v32  ;;  %v1381_v34 = vpop.f32.mrb[1].mxu0  ;;  %v521_v36 = vsel %vm520_vm4, %v1703_v32, 0.0  ;;  %v1433_v42 = vpop.f32.mrb[1].mxu1 }
  0xde   :  { %v1707_v35 = vpop.f32.mrb[2].mxu0  ;;  %v1719_v45 = vpop.f32.mrb[2].mxu1 }
  0xdf   :  { %v522_v37 = vsel %vm520_vm4, %v1707_v35, 0.0  ;;  %v626_v38 = vmul.f32 %v1707_v35, %v1707_v35  ;;  %v1382_v39 = vpop.f32.mrb[3].mxu0  ;;  %v674_v43 = vsel %vm520_vm4, %v625_v33, 0.0  ;;  %v1434_v47 = vpop.f32.mrb[3].mxu1 }
  0xe0   :  { %v523_v41 = vadd.f32 %v522_v37, %v521_v36 }
  0xe1   :  { %v675_v44 = vsel %vm520_vm4, %v626_v38, 0.0 }
  0xe2   :  { %v676_v46 = vadd.f32 %v675_v44, %v674_v43 }
  0xe4   :  { %v1721_v48 = vpop.f32.mrb[4].mxu0  ;;  %v1734_v58 = vpop.f32.mrb[4].mxu1 }
  0xe5   :  { %v524_v49 = vsel %vm520_vm4, %v1721_v48, 0.0  ;;  %v627_v50 = vmul.f32 %v1721_v48, %v1721_v48  ;;  %v1385_v51 = vpop.f32.mrb[5].mxu0  ;;  %v1437_v61 = vpop.f32.mrb[5].mxu1 }
  0xe6   :  { %v525_v52 = vadd.f32 %v524_v49, %v523_v41  ;;  %v1727_v53 = vpop.f32.mrb[6].mxu0  ;;  %v1737_v63 = vpop.f32.mrb[6].mxu1 }
  0xe7   :  { %v677_v54 = vsel %vm520_vm4, %v627_v50, 0.0  ;;  %v526_v55 = vsel %vm520_vm4, %v1727_v53, 0.0  ;;  %v628_v56 = vmul.f32 %v1727_v53, %v1727_v53  ;;  %v1386_v57 = vpop.f32.mrb[7].mxu0  ;;  %v1438_v1 = vpop.f32.mrb[7].mxu1 }
  0xe8   :  { %v678_v59 = vadd.f32 %v677_v54, %v676_v46  ;;  %v527_v60 = vadd.f32 %v526_v55, %v525_v52 }
  0xe9   :  { %v679_v62 = vsel %vm520_vm4, %v628_v56, 0.0 }
  0xea   :  { %v680_v0 = vadd.f32 %v679_v62, %v678_v59 }
  0xec   :  { %v1739_v2 = vpop.f32.mrb[8].mxu0  ;;  %v1752_v12 = vpop.f32.mrb[8].mxu1 }
  0xed   :  { %v528_v3 = vsel %vm520_vm4, %v1739_v2, 0.0  ;;  %v629_v4 = vmul.f32 %v1739_v2, %v1739_v2  ;;  %v1389_v5 = vpop.f32.mrb[9].mxu0  ;;  %v1441_v15 = vpop.f32.mrb[9].mxu1 }
  0xee   :  { %v529_v6 = vadd.f32 %v528_v3, %v527_v60  ;;  %v1745_v7 = vpop.f32.mrb[10].mxu0  ;;  %v1755_v17 = vpop.f32.mrb[10].mxu1 }
  0xef   :  { %v681_v8 = vsel %vm520_vm4, %v629_v4, 0.0  ;;  %v530_v9 = vsel %vm520_vm4, %v1745_v7, 0.0  ;;  %v630_v10 = vmul.f32 %v1745_v7, %v1745_v7  ;;  %v1390_v11 = vpop.f32.mrb[11].mxu0  ;;  %v1442_v19 = vpop.f32.mrb[11].mxu1 }
  0xf0   :  { %v682_v13 = vadd.f32 %v681_v8, %v680_v0  ;;  %v531_v14 = vadd.f32 %v530_v9, %v529_v6 }
  0xf1   :  { %v683_v16 = vsel %vm520_vm4, %v630_v10, 0.0 }
  0xf2   :  { %v684_v18 = vadd.f32 %v683_v16, %v682_v13 }
  0xf4   :  { %v1757_v20 = vpop.f32.mrb[12].mxu0  ;;  %v1770_v30 = vpop.f32.mrb[12].mxu1 }
  0xf5   :  { %v532_v21 = vsel %vm520_vm4, %v1757_v20, 0.0  ;;  %v631_v22 = vmul.f32 %v1757_v20, %v1757_v20  ;;  %v1393_v23 = vpop.f32.mrb[13].mxu0  ;;  %v1445_v34 = vpop.f32.mrb[13].mxu1 }
  0xf6   :  { %v533_v24 = vadd.f32 %v532_v21, %v531_v14  ;;  %v1763_v25 = vpop.f32.mrb[14].mxu0  ;;  %v1773_v37 = vpop.f32.mrb[14].mxu1 }
  0xf7   :  { %v685_v26 = vsel %vm520_vm4, %v631_v22, 0.0  ;;  %v534_v27 = vsel %vm520_vm4, %v1763_v25, 0.0  ;;  %v632_v28 = vmul.f32 %v1763_v25, %v1763_v25  ;;  %v1394_v29 = vpop.f32.mrb[15].mxu0  ;;  %v1446_v39 = vpop.f32.mrb[15].mxu1 }
  0xf8   :  { %v686_v31 = vadd.f32 %v685_v26, %v684_v18  ;;  %v535_v33 = vadd.f32 %v534_v27, %v533_v24 }
  0xf9   :  { %v687_v36 = vsel %vm520_vm4, %v632_v28, 0.0 }
  0xfa   :  { %v688_v38 = vadd.f32 %v687_v36, %v686_v31 }
  0xfc   :  { %v1775_v41 = vpop.f32.mrb[16].mxu0  ;;  %v1788_v54 = vpop.f32.mrb[16].mxu1 }
  0xfd   :  { %v536_v42 = vsel %vm520_vm4, %v1775_v41, 0.0  ;;  %v633_v43 = vmul.f32 %v1775_v41, %v1775_v41  ;;  %v1397_v44 = vpop.f32.mrb[17].mxu0  ;;  %v1449_v57 = vpop.f32.mrb[17].mxu1 }
  0xfe   :  { %v537_v46 = vadd.f32 %v536_v42, %v535_v33  ;;  %v1781_v47 = vpop.f32.mrb[18].mxu0  ;;  %v1791_v60 = vpop.f32.mrb[18].mxu1 }
  0xff   :  { %v689_v49 = vsel %vm520_vm4, %v633_v43, 0.0  ;;  %v538_v50 = vsel %vm520_vm4, %v1781_v47, 0.0  ;;  %v634_v51 = vmul.f32 %v1781_v47, %v1781_v47  ;;  %v1398_v52 = vpop.f32.mrb[19].mxu0  ;;  %v1450_v62 = vpop.f32.mrb[19].mxu1 }
 0x100   :  { %v690_v55 = vadd.f32 %v689_v49, %v688_v38  ;;  %v539_v56 = vadd.f32 %v538_v50, %v537_v46 }
 0x101   :  { %v691_v59 = vsel %vm520_vm4, %v634_v51, 0.0 }
 0x102   :  { %v692_v61 = vadd.f32 %v691_v59, %v690_v55 }
 0x104   :  { %v1793_v0 = vpop.f32.mrb[20].mxu0  ;;  %v1806_v13 = vpop.f32.mrb[20].mxu1 }
 0x105   :  { %v540_v1 = vsel %vm520_vm4, %v1793_v0, 0.0  ;;  %v635_v3 = vmul.f32 %v1793_v0, %v1793_v0  ;;  %v1401_v4 = vpop.f32.mrb[21].mxu0  ;;  %v1453_v16 = vpop.f32.mrb[21].mxu1 }
 0x106   :  { %v541_v5 = vadd.f32 %v540_v1, %v539_v56  ;;  %v1799_v6 = vpop.f32.mrb[22].mxu0  ;;  %v1809_v19 = vpop.f32.mrb[22].mxu1 }
 0x107   :  { %v693_v8 = vsel %vm520_vm4, %v635_v3, 0.0  ;;  %v542_v9 = vsel %vm520_vm4, %v1799_v6, 0.0  ;;  %v636_v10 = vmul.f32 %v1799_v6, %v1799_v6  ;;  %v1402_v11 = vpop.f32.mrb[23].mxu0  ;;  %v1454_v22 = vpop.f32.mrb[23].mxu1 }
 0x108   :  { %v694_v14 = vadd.f32 %v693_v8, %v692_v61  ;;  %v543_v15 = vadd.f32 %v542_v9, %v541_v5 }
 0x109   :  { %v695_v18 = vsel %vm520_vm4, %v636_v10, 0.0 }
 0x10a   :  { %v696_v21 = vadd.f32 %v695_v18, %v694_v14 }
 0x10c   :  { %v1811_v23 = vpop.f32.mrb[24].mxu0  ;;  %v1824_v38 = vpop.f32.mrb[24].mxu1 }
 0x10d   :  { %v544_v24 = vsel %vm520_vm4, %v1811_v23, 0.0  ;;  %v637_v26 = vmul.f32 %v1811_v23, %v1811_v23  ;;  %v1405_v27 = vpop.f32.mrb[25].mxu0  ;;  %v1457_v43 = vpop.f32.mrb[25].mxu1 }
 0x10e   :  { %v545_v28 = vadd.f32 %v544_v24, %v543_v15  ;;  %v1817_v29 = vpop.f32.mrb[26].mxu0  ;;  %v1827_v46 = vpop.f32.mrb[26].mxu1 }
 0x10f   :  { %v697_v31 = vsel %vm520_vm4, %v637_v26, 0.0  ;;  %v546_v33 = vsel %vm520_vm4, %v1817_v29, 0.0  ;;  %v638_v34 = vmul.f32 %v1817_v29, %v1817_v29  ;;  %v1406_v36 = vpop.f32.mrb[27].mxu0  ;;  %v1458_v50 = vpop.f32.mrb[27].mxu1 }
 0x110   :  { %v698_v39 = vadd.f32 %v697_v31, %v696_v21  ;;  %v547_v42 = vadd.f32 %v546_v33, %v545_v28 }
 0x111   :  { %v699_v44 = vsel %vm520_vm4, %v638_v34, 0.0 }
 0x112   :  { %v700_v49 = vadd.f32 %v699_v44, %v698_v39 }
 0x114   :  { %v1829_v51 = vpop.f32.mrb[28].mxu0  ;;  %v1842_v4 = vpop.f32.mrb[28].mxu1 }
 0x115   :  { %v548_v52 = vsel %vm520_vm4, %v1829_v51, 0.0  ;;  %v639_v55 = vmul.f32 %v1829_v51, %v1829_v51  ;;  %v1409_v56 = vpop.f32.mrb[29].mxu0  ;;  %2540 = vst [vmem:[#allocation2_spill] sm:$0xff] %v1842_v4  ;;  %v1461_v9 = vpop.f32.mrb[29].mxu1 }
 0x116   :  { %v549_v57 = vadd.f32 %v548_v52, %v547_v42  ;;  %v1835_v59 = vpop.f32.mrb[30].mxu0  ;;  %v1845_v11 = vpop.f32.mrb[30].mxu1 }
 0x117   :  { %v701_v61 = vsel %vm520_vm4, %v639_v55, 0.0  ;;  %v550_v62 = vsel %vm520_vm4, %v1835_v59, 0.0  ;;  %v640_v1 = vmul.f32 %v1835_v59, %v1835_v59  ;;  %v1410_v3 = vpop.f32.mrb[31].mxu0  ;;  %2541 = vst [vmem:[#allocation3_spill] sm:$0xff] %v1845_v11  ;;  %v1462_v15 = vpop.f32.mrb[31].mxu1 }
 0x118   :  { %v702_v5 = vadd.f32 %v701_v61, %v700_v49  ;;  %v551_v8 = vadd.f32 %v550_v62, %v549_v57 }
 0x119   :  { %v703_v10 = vsel %vm520_vm4, %v640_v1, 0.0 }
 0x11a   :  { %v704_v14 = vadd.f32 %v703_v10, %v702_v5 }
 0x11c   :  { %v1847_v16 = vpop.f32.mrb[32].mxu0  ;;  %v1860_v34 = vpop.f32.mrb[32].mxu1 }
 0x11d   :  { %v552_v18 = vsel %vm520_vm4, %v1847_v16, 0.0  ;;  %v641_v21 = vmul.f32 %v1847_v16, %v1847_v16  ;;  %v1413_v22 = vpop.f32.mrb[33].mxu0  ;;  %2542 = vst [vmem:[#allocation4_spill] sm:$0xff] %v1860_v34  ;;  %v1465_v42 = vpop.f32.mrb[33].mxu1 }
 0x11e   :  { %v553_v24 = vadd.f32 %v552_v18, %v551_v8  ;;  %v1853_v26 = vpop.f32.mrb[34].mxu0  ;;  %v1863_v44 = vpop.f32.mrb[34].mxu1 }
 0x11f   :  { %v705_v27 = vsel %vm520_vm4, %v641_v21, 0.0  ;;  %v554_v28 = vsel %vm520_vm4, %v1853_v26, 0.0  ;;  %v642_v31 = vmul.f32 %v1853_v26, %v1853_v26  ;;  %v1414_v33 = vpop.f32.mrb[35].mxu0  ;;  %2543 = vst [vmem:[#allocation5_spill] sm:$0xff] %v1863_v44  ;;  %v1466_v50 = vpop.f32.mrb[35].mxu1 }
 0x120   :  { %v706_v36 = vadd.f32 %v705_v27, %v704_v14  ;;  %v555_v39 = vadd.f32 %v554_v28, %v553_v24 }
 0x121   :  { %v707_v43 = vsel %vm520_vm4, %v642_v31, 0.0 }
 0x122   :  { %v708_v49 = vadd.f32 %v707_v43, %v706_v36 }
 0x124   :  { %v1865_v52 = vpop.f32.mrb[36].mxu0  ;;  %v1878_v9 = vpop.f32.mrb[36].mxu1 }
 0x125   :  { %v556_v55 = vsel %vm520_vm4, %v1865_v52, 0.0  ;;  %v643_v56 = vmul.f32 %v1865_v52, %v1865_v52  ;;  %v1417_v57 = vpop.f32.mrb[37].mxu0  ;;  %2544 = vst [vmem:[#allocation6_spill] sm:$0xff] %v1878_v9  ;;  %v1469_v15 = vpop.f32.mrb[37].mxu1 }
 0x126   :  { %v557_v61 = vadd.f32 %v556_v55, %v555_v39  ;;  %v1871_v62 = vpop.f32.mrb[38].mxu0  ;;  %v1881_v21 = vpop.f32.mrb[38].mxu1 }
 0x127   :  { %v709_v1 = vsel %vm520_vm4, %v643_v56, 0.0  ;;  %v558_v3 = vsel %vm520_vm4, %v1871_v62, 0.0  ;;  %v644_v5 = vmul.f32 %v1871_v62, %v1871_v62  ;;  %v1418_v8 = vpop.f32.mrb[39].mxu0  ;;  %2545 = vst [vmem:[#allocation7_spill] sm:$0xff] %v1881_v21  ;;  %v1470_v24 = vpop.f32.mrb[39].mxu1 }
 0x128   :  { %v710_v10 = vadd.f32 %v709_v1, %v708_v49  ;;  %v559_v14 = vadd.f32 %v558_v3, %v557_v61 }
 0x129   :  { %v711_v18 = vsel %vm520_vm4, %v644_v5, 0.0 }
 0x12a   :  { %v712_v22 = vadd.f32 %v711_v18, %v710_v10 }
 0x12c   :  { %v1883_v27 = vpop.f32.mrb[40].mxu0  ;;  %v1896_v55 = vpop.f32.mrb[40].mxu1 }
 0x12d   :  { %v560_v28 = vsel %vm520_vm4, %v1883_v27, 0.0  ;;  %v645_v31 = vmul.f32 %v1883_v27, %v1883_v27  ;;  %v1421_v33 = vpop.f32.mrb[41].mxu0  ;;  %2546 = vst [vmem:[#allocation8_spill] sm:$0xff] %v1896_v55  ;;  %v1473_v61 = vpop.f32.mrb[41].mxu1 }
 0x12e   :  { %v561_v36 = vadd.f32 %v560_v28, %v559_v14  ;;  %v1889_v39 = vpop.f32.mrb[42].mxu0  ;;  %v1899_v3 = vpop.f32.mrb[42].mxu1 }
 0x12f   :  { %v713_v42 = vsel %vm520_vm4, %v645_v31, 0.0  ;;  %v562_v43 = vsel %vm520_vm4, %v1889_v39, 0.0  ;;  %v646_v49 = vmul.f32 %v1889_v39, %v1889_v39  ;;  %v1422_v50 = vpop.f32.mrb[43].mxu0  ;;  %2547 = vst [vmem:[#allocation9_spill] sm:$0xff] %v1899_v3  ;;  %v1474_v8 = vpop.f32.mrb[43].mxu1 }
 0x130   :  { %v714_v56 = vadd.f32 %v713_v42, %v712_v22  ;;  %v563_v57 = vadd.f32 %v562_v43, %v561_v36 }
 0x131   :  { %v715_v1 = vsel %vm520_vm4, %v646_v49, 0.0 }
 0x132   :  { %v716_v5 = vadd.f32 %v715_v1, %v714_v56 }
 0x134   :  { %v1901_v10 = vpop.f32.mrb[44].mxu0  ;;  %v1914_v42 = vpop.f32.mrb[44].mxu1 }
 0x135   :  { %v564_v14 = vsel %vm520_vm4, %v1901_v10, 0.0  ;;  %v647_v15 = vmul.f32 %v1901_v10, %v1901_v10  ;;  %v1425_v18 = vpop.f32.mrb[45].mxu0  ;;  %2549 = vst [vmem:[#allocation11_spill] sm:$0xff] %v1914_v42  ;;  %v1477_v50 = vpop.f32.mrb[45].mxu1 }
 0x136   :  { %v565_v24 = vadd.f32 %v564_v14, %v563_v57  ;;  %v1907_v28 = vpop.f32.mrb[46].mxu0  ;;  %v517_v61 = vpop.f32.mrb[46].mxu1 }
 0x137   :  { %2548 = vst [vmem:[#allocation10_spill] sm:$0xff] %v1907_v28  ;;  %v717_v22 = vsel %vm520_vm4, %v647_v15, 0.0  ;;  %v566_v31 = vsel %vm520_vm4, %v1907_v28, 0.0  ;;  %v648_v33 = vmul.f32 %v1907_v28, %v1907_v28  ;;  %v1426_v36 = vpop.f32.mrb[47].mxu0  ;;  %v1478_v1 = vpop.f32.mrb[47].mxu1 }
 0x138   :  { %v718_v43 = vadd.f32 %v717_v22, %v716_v5  ;;  %v567_v49 = vadd.f32 %v566_v31, %v565_v24  ;;  %v651_v5 = vmul.f32 %v1715_v40, %v1715_v40 }
 0x139   :  { %v719_v56 = vsel %vm520_vm4, %v648_v33, 0.0 }
 0x13a   :  { %v720_v57 = vadd.f32 %v719_v56, %v718_v43  ;;  %v572_v56 = vsel %vm520_vm4, %v1715_v40, 0.0 }
 0x13c   :  { %v1917_v8 = vpop.f32.mrb[48].mxu0 }
 0x13d   :  { %v568_v14 = vsel %vm520_vm4, %v1917_v8, 0.0  ;;  %v649_v15 = vmul.f32 %v1917_v8, %v1917_v8  ;;  %v1429_v18 = vpop.f32.mrb[49].mxu0 }
 0x13e   :  { %v569_v36 = vadd.f32 %v568_v14, %v567_v49  ;;  %v1923_v28 = vpop.f32.mrb[50].mxu0  ;;  %v652_v49 = vmul.f32 %v1719_v45, %v1719_v45  ;;  %v574_v18 = vsel %vm520_vm4, %v1719_v45, 0.0 }
 0x13f   :  { %v721_v24 = vsel %vm520_vm4, %v649_v15, 0.0  ;;  %v570_v22 = vsel %vm520_vm4, %v1923_v28, 0.0  ;;  %v650_v31 = vmul.f32 %v1923_v28, %v1923_v28  ;;  %v1430_v33 = vpop.f32.mrb[51].mxu0  ;;  %v725_v15 = vsel %vm520_vm4, %v651_v5, 0.0 }
 0x140   :  { %v722_v43 = vadd.f32 %v721_v24, %v720_v57  ;;  %v571_v50 = vadd.f32 %v570_v22, %v569_v36  ;;  %v653_v33 = vmul.f32 %v1734_v58, %v1734_v58  ;;  %v727_v24 = vsel %vm520_vm4, %v652_v49, 0.0 }
 0x141   :  { %v723_v61 = vsel %vm520_vm4, %v650_v31, 0.0  ;;  %v576_v22 = vsel %vm520_vm4, %v1734_v58, 0.0  ;;  %v654_v31 = vmul.f32 %v1737_v63, %v1737_v63 }
 0x142   :  { %v573_v1 = vadd.f32 %v572_v56, %v571_v50  ;;  %v724_v14 = vadd.f32 %v723_v61, %v722_v43  ;;  %v729_v5 = vsel %vm520_vm4, %v653_v33, 0.0  ;;  %v578_v56 = vsel %vm520_vm4, %v1737_v63, 0.0 }
 0x143   :  { %v655_v61 = vmul.f32 %v1752_v12, %v1752_v12  ;;  %v731_v49 = vsel %vm520_vm4, %v654_v31, 0.0 }
 0x144   :  { %v575_v57 = vadd.f32 %v574_v18, %v573_v1  ;;  %v726_v36 = vadd.f32 %v725_v15, %v724_v14  ;;  %v580_v15 = vsel %vm520_vm4, %v1752_v12, 0.0  ;;  %v656_v18 = vmul.f32 %v1755_v17, %v1755_v17 }
 0x145   :  { %v733_v33 = vsel %vm520_vm4, %v655_v61, 0.0 }
 0x146   :  { %v577_v50 = vadd.f32 %v576_v22, %v575_v57  ;;  %v728_v43 = vadd.f32 %v727_v24, %v726_v36  ;;  %v582_v24 = vsel %vm520_vm4, %v1755_v17, 0.0  ;;  %v657_v22 = vmul.f32 %v1770_v30, %v1770_v30 }
 0x147   :  { %v735_v31 = vsel %vm520_vm4, %v656_v18, 0.0 }
 0x148   :  { %v579_v1 = vadd.f32 %v578_v56, %v577_v50  ;;  %v730_v14 = vadd.f32 %v729_v5, %v728_v43  ;;  %v584_v5 = vsel %vm520_vm4, %v1770_v30, 0.0  ;;  %v658_v56 = vmul.f32 %v1773_v37, %v1773_v37 }
 0x149   :  { %v737_v61 = vsel %vm520_vm4, %v657_v22, 0.0 }
 0x14a   :  { %v581_v57 = vadd.f32 %v580_v15, %v579_v1  ;;  %v732_v36 = vadd.f32 %v731_v49, %v730_v14  ;;  %v586_v49 = vsel %vm520_vm4, %v1773_v37, 0.0  ;;  %v659_v15 = vmul.f32 %v1788_v54, %v1788_v54 }
 0x14b   :  { %v739_v18 = vsel %vm520_vm4, %v658_v56, 0.0 }
 0x14c   :  { %v583_v50 = vadd.f32 %v582_v24, %v581_v57  ;;  %v734_v43 = vadd.f32 %v733_v33, %v732_v36  ;;  %v588_v33 = vsel %vm520_vm4, %v1788_v54, 0.0  ;;  %v660_v24 = vmul.f32 %v1791_v60, %v1791_v60 }
 0x14d   :  { %v741_v22 = vsel %vm520_vm4, %v659_v15, 0.0 }
 0x14e   :  { %v736_v1 = vadd.f32 %v735_v31, %v734_v43  ;;  %v585_v14 = vadd.f32 %v584_v5, %v583_v50  ;;  %v590_v31 = vsel %vm520_vm4, %v1791_v60, 0.0  ;;  %v661_v5 = vmul.f32 %v1806_v13, %v1806_v13 }
 0x14f   :  { %v743_v56 = vsel %vm520_vm4, %v660_v24, 0.0 }
 0x150   :  { %v587_v57 = vadd.f32 %v586_v49, %v585_v14  ;;  %v738_v36 = vadd.f32 %v737_v61, %v736_v1  ;;  %v592_v61 = vsel %vm520_vm4, %v1806_v13, 0.0  ;;  %v662_v49 = vmul.f32 %v1809_v19, %v1809_v19 }
 0x151   :  { %v745_v15 = vsel %vm520_vm4, %v661_v5, 0.0 }
 0x152   :  { %v589_v43 = vadd.f32 %v588_v33, %v587_v57  ;;  %v740_v50 = vadd.f32 %v739_v18, %v738_v36  ;;  %v594_v18 = vsel %vm520_vm4, %v1809_v19, 0.0  ;;  %v663_v33 = vmul.f32 %v1824_v38, %v1824_v38 }
 0x153   :  { %v747_v24 = vsel %vm520_vm4, %v662_v49, 0.0 }
 0x154   :  { %v591_v14 = vadd.f32 %v590_v31, %v589_v43  ;;  %v742_v1 = vadd.f32 %v741_v22, %v740_v50  ;;  %v596_v22 = vsel %vm520_vm4, %v1824_v38, 0.0  ;;  %v664_v31 = vmul.f32 %v1827_v46, %v1827_v46 }
 0x155   :  { %v749_v5 = vsel %vm520_vm4, %v663_v33, 0.0 }
 0x156   :  { %v593_v57 = vadd.f32 %v592_v61, %v591_v14  ;;  %v744_v36 = vadd.f32 %v743_v56, %v742_v1  ;;  %v598_v56 = vsel %vm520_vm4, %v1827_v46, 0.0  ;;  %v665_v61 = vmul.f32 %v1842_v4, %v1842_v4 }
 0x157   :  { %v751_v49 = vsel %vm520_vm4, %v664_v31, 0.0 }
 0x158   :  { %v595_v43 = vadd.f32 %v594_v18, %v593_v57  ;;  %v746_v50 = vadd.f32 %v745_v15, %v744_v36  ;;  %v600_v15 = vsel %vm520_vm4, %v1842_v4, 0.0  ;;  %v666_v18 = vmul.f32 %v1845_v11, %v1845_v11 }
 0x159   :  { %v753_v33 = vsel %vm520_vm4, %v665_v61, 0.0 }
 0x15a   :  { %v597_v14 = vadd.f32 %v596_v22, %v595_v43  ;;  %v748_v1 = vadd.f32 %v747_v24, %v746_v50  ;;  %v602_v24 = vsel %vm520_vm4, %v1845_v11, 0.0  ;;  %v667_v22 = vmul.f32 %v1860_v34, %v1860_v34 }
 0x15b   :  { %v755_v31 = vsel %vm520_vm4, %v666_v18, 0.0 }
 0x15c   :  { %v750_v57 = vadd.f32 %v749_v5, %v748_v1  ;;  %v599_v36 = vadd.f32 %v598_v56, %v597_v14  ;;  %v604_v5 = vsel %vm520_vm4, %v1860_v34, 0.0  ;;  %v668_v56 = vmul.f32 %v1863_v44, %v1863_v44 }
 0x15d   :  { %v757_v61 = vsel %vm520_vm4, %v667_v22, 0.0 }
 0x15e   :  { %v752_v43 = vadd.f32 %v751_v49, %v750_v57  ;;  %v601_v50 = vadd.f32 %v600_v15, %v599_v36  ;;  %v606_v49 = vsel %vm520_vm4, %v1863_v44, 0.0  ;;  %v669_v15 = vmul.f32 %v1878_v9, %v1878_v9 }
 0x15f   :  { %v759_v18 = vsel %vm520_vm4, %v668_v56, 0.0 }
 0x160   :  { %v754_v1 = vadd.f32 %v753_v33, %v752_v43  ;;  %v603_v14 = vadd.f32 %v602_v24, %v601_v50  ;;  %v608_v33 = vsel %vm520_vm4, %v1878_v9, 0.0  ;;  %v670_v24 = vmul.f32 %v1881_v21, %v1881_v21 }
 0x161   :  { %v761_v22 = vsel %vm520_vm4, %v669_v15, 0.0 }
 0x162   :  { %v756_v57 = vadd.f32 %v755_v31, %v754_v1  ;;  %v605_v36 = vadd.f32 %v604_v5, %v603_v14  ;;  %v610_v31 = vsel %vm520_vm4, %v1881_v21, 0.0  ;;  %v671_v5 = vmul.f32 %v1896_v55, %v1896_v55 }
 0x163   :  { %v763_v56 = vsel %vm520_vm4, %v670_v24, 0.0 }
 0x164   :  { %v758_v43 = vadd.f32 %v757_v61, %v756_v57  ;;  %v607_v50 = vadd.f32 %v606_v49, %v605_v36  ;;  %v612_v61 = vsel %vm520_vm4, %v1896_v55, 0.0  ;;  %v672_v49 = vmul.f32 %v1899_v3, %v1899_v3 }
 0x166   :  { %v760_v1 = vadd.f32 %v759_v18, %v758_v43  ;;  %v609_v14 = vadd.f32 %v608_v33, %v607_v50  ;;  %v673_v43 = vmul.f32 %v1914_v42, %v1914_v42  ;;  %v765_v18 = vsel %vm520_vm4, %v671_v5, 0.0 }
 0x167   :  { %v614_v33 = vsel %vm520_vm4, %v1899_v3, 0.0 }
 0x168   :  { %v762_v57 = vadd.f32 %v761_v22, %v760_v1  ;;  %v611_v36 = vadd.f32 %v610_v31, %v609_v14  ;;  %v616_v1 = vsel %vm520_vm4, %v1914_v42, 0.0  ;;  %v767_v22 = vsel %vm520_vm4, %v672_v49, 0.0 }
 0x169   :  { %v769_v31 = vsel %vm520_vm4, %v673_v43, 0.0 }
 0x16a   :  { %v764_v15 = vadd.f32 %v763_v56, %v762_v57  ;;  %v613_v50 = vadd.f32 %v612_v61, %v611_v36 }
 0x16c   :  { %v766_v24 = vadd.f32 %v765_v18, %v764_v15  ;;  %v615_v14 = vadd.f32 %v614_v33, %v613_v50 }
 0x16e   :  { %v768_v55 = vadd.f32 %v767_v22, %v766_v24  ;;  %v617_v21 = vadd.f32 %v616_v1, %v615_v14  ;;  %v789_v1 = vlaneseq }
 0x170   :  { %v618_v9 = vrot.slane %v617_v21, 4  ;;  %v770_v44 = vadd.f32 %v769_v31, %v768_v55  ;;  %v790_v55 = vshrl.u32 %v789_v1, 7  ;;  %v2554_v1 = vld [vmem:[#allocation5_spill] sm:$0xff] }
 0x172   :  { %v619_v57 = vadd.f32 %v618_v9, %v617_v21  ;;  %v771_v36 = vrot.slane %v770_v44, 4  ;;  %v791_v9 = vsub.s32 0, %v790_v55  ;;  %v2555_v55 = vld [vmem:[#allocation6_spill] sm:$0xff] }
 0x174   :  { %v620_v56 = vrot.slane %v619_v57, 2  ;;  %v772_v5 = vadd.f32 %v771_v36, %v770_v44  ;;  %v781_v44 = vld [vmem:[%s2527_s2] sm:$0x1] }
 0x176   :  { %v621_v61 = vadd.f32 %v620_v56, %v619_v57  ;;  %v773_v34 = vrot.slane %v772_v5, 2 }
 0x178   :  { %v622_v3 = vrot.slane %v621_v61, 1  ;;  %v774_v11 = vadd.f32 %v773_v34, %v772_v5 }
 0x17a   :  { %v623_v4 = vadd.f32 %v622_v3, %v621_v61  ;;  %v775_v42 = vrot.slane %v774_v11, 1 }
 0x17c   :  { %v624_v15 = vmul.f32 0.0025510204, %v623_v4  ;;  %v776_v50 = vadd.f32 %v775_v42, %v774_v11  ;;  %v785_v4 = vld [vmem:[%s2528_s3] sm:$0x1] }
 0x17e   :  { %v777_v18 = vmul.f32 0.0025510204, %v776_v50  ;;  %v778_v49 = vmul.f32 %v624_v15, %v624_v15 }
 0x180   :  { %v779_v33 = vsub.f32 %v777_v18, %v778_v49  ;;  %v2550_v18 = vld [vmem:[#allocation10_spill] sm:$0xff] }
 0x182   :  { %v780_v43 = vmax.f32 %v779_v33, 0.0  ;;  %v2551_v33 = vld [vmem:[#allocation2_spill] sm:$0xff] }
 0x184   :  { %v782_v24 = vadd.f32 1e-05, %v780_v43  ;;  %v2552_v43 = vld [vmem:[#allocation3_spill] sm:$0xff] }
 0x186   :  { %1513 = vrsqrt.f32 %v782_v24  ;;  %v2553_v24 = vld [vmem:[#allocation4_spill] sm:$0xff] }
 0x190   :  { %v1514_v21 = vpop.eup %1513 }
 0x191   :  { %v784_v14 = vmul.f32 %v1514_v21, %v781_v44  ;;  %v2556_v44 = vld [vmem:[#allocation7_spill] sm:$0xff]  ;;  %v2557_v21 = vld [vmem:[#allocation8_spill] sm:$0xff] }
 0x193   :  { %v786_v11 = vmul.f32 %v784_v14, %v624_v15  ;;  %v792_v34 = vrot.slane %v784_v14, %v791_v9  ;;  %v2558_v14 = vld [vmem:[#allocation9_spill] sm:$0xff] }
 0x195   :  { %v787_v3 = vsub.f32 %v785_v4, %v786_v11  ;;  %v794_v42 = vmul.f32 %v792_v34, %v1703_v32  ;;  %v795_v22 = vmul.f32 %v792_v34, %v1707_v35  ;;  %v796_v31 = vmul.f32 %v792_v34, %v1721_v48  ;;  %v2559_v4 = vld [vmem:[#allocation11_spill] sm:$0xff] }
 0x196   :  { %v797_v57 = vmul.f32 %v792_v34, %v1727_v53  ;;  %v798_v36 = vmul.f32 %v792_v34, %v1739_v2  ;;  %v799_v56 = vmul.f32 %v792_v34, %v1745_v7  ;;  %v800_v5 = vmul.f32 %v792_v34, %v1757_v20 }
 0x197   :  { %v801_v61 = vmul.f32 %v792_v34, %v1763_v25  ;;  %v802_v15 = vmul.f32 %v792_v34, %v1775_v41  ;;  %v803_v50 = vmul.f32 %v792_v34, %v1781_v47  ;;  %v804_v32 = vmul.f32 %v792_v34, %v1793_v0 }
 0x198   :  { %v805_v35 = vmul.f32 %v792_v34, %v1799_v6  ;;  %v806_v48 = vmul.f32 %v792_v34, %v1811_v23  ;;  %v807_v53 = vmul.f32 %v792_v34, %v1817_v29  ;;  %v808_v2 = vmul.f32 %v792_v34, %v1829_v51 }
 0x199   :  { %v809_v7 = vmul.f32 %v792_v34, %v1835_v59  ;;  %v810_v20 = vmul.f32 %v792_v34, %v1847_v16  ;;  %v811_v25 = vmul.f32 %v792_v34, %v1853_v26  ;;  %v812_v41 = vmul.f32 %v792_v34, %v1865_v52 }
 0x19a   :  { %v813_v47 = vmul.f32 %v792_v34, %v1871_v62  ;;  %v814_v0 = vmul.f32 %v792_v34, %v1883_v27  ;;  %v815_v6 = vmul.f32 %v792_v34, %v1889_v39  ;;  %v816_v23 = vmul.f32 %v792_v34, %v1901_v10 }
 0x19b   :  { %v817_v29 = vmul.f32 %v792_v34, %v2550_v18  ;;  %v818_v51 = vmul.f32 %v792_v34, %v1917_v8  ;;  %v819_v59 = vmul.f32 %v792_v34, %v1923_v28  ;;  %v820_v16 = vmul.f32 %v792_v34, %v1715_v40 }
 0x19c   :  { %v821_v26 = vmul.f32 %v792_v34, %v1719_v45  ;;  %v822_v52 = vmul.f32 %v792_v34, %v1734_v58  ;;  %v823_v62 = vmul.f32 %v792_v34, %v1737_v63  ;;  %v824_v27 = vmul.f32 %v792_v34, %v1752_v12 }
 0x19d   :  { %v825_v39 = vmul.f32 %v792_v34, %v1755_v17  ;;  %v826_v10 = vmul.f32 %v792_v34, %v1770_v30  ;;  %v827_v49 = vmul.f32 %v792_v34, %v1773_v37  ;;  %v828_v8 = vmul.f32 %v792_v34, %v1788_v54 }
 0x19e   :  { %v829_v28 = vmul.f32 %v792_v34, %v1791_v60  ;;  %v830_v40 = vmul.f32 %v792_v34, %v1806_v13  ;;  %v831_v45 = vmul.f32 %v792_v34, %v1809_v19  ;;  %v832_v58 = vmul.f32 %v792_v34, %v1824_v38 }
 0x19f   :  { %v833_v63 = vmul.f32 %v792_v34, %v1827_v46  ;;  %v834_v12 = vmul.f32 %v792_v34, %v2551_v33  ;;  %v835_v17 = vmul.f32 %v792_v34, %v2552_v43  ;;  %v836_v30 = vmul.f32 %v792_v34, %v2553_v24 }
 0x1a0   :  { %v837_v37 = vmul.f32 %v792_v34, %v2554_v1  ;;  %v838_v54 = vmul.f32 %v792_v34, %v2555_v55  ;;  %v839_v60 = vmul.f32 %v792_v34, %v2556_v44  ;;  %v840_v13 = vmul.f32 %v792_v34, %v2557_v21 }
 0x1a1   :  { %v841_v19 = vmul.f32 %v792_v34, %v2558_v14  ;;  %v842_v38 = vmul.f32 %v792_v34, %v2559_v4  ;;  %v847_v11 = vrot.slane %v787_v3, %v791_v9 }
 0x1a3   :  { %v2101_v46 = vadd.f32 %v847_v11, %v794_v42  ;;  %v2103_v18 = vadd.f32 %v847_v11, %v795_v22  ;;  %v2105_v33 = vadd.f32 %v847_v11, %v796_v31  ;;  %v2107_v43 = vadd.f32 %v847_v11, %v797_v57 }
 0x1a4   :  { %v2109_v24 = vadd.f32 %v847_v11, %v798_v36  ;;  %v2111_v1 = vadd.f32 %v847_v11, %v799_v56  ;;  %v2113_v55 = vadd.f32 %v847_v11, %v800_v5  ;;  %v2115_v44 = vadd.f32 %v847_v11, %v801_v61 }
 0x1a5   :  { %v2117_v21 = vadd.f32 %v847_v11, %v802_v15  ;;  %v2119_v34 = vadd.f32 %v847_v11, %v803_v50  ;;  %v2121_v9 = vadd.f32 %v847_v11, %v804_v32  ;;  %v2123_v3 = vadd.f32 %v847_v11, %v805_v35 }
 0x1a6   :  { %v2125_v42 = vadd.f32 %v847_v11, %v806_v48  ;;  %v2127_v22 = vadd.f32 %v847_v11, %v807_v53  ;;  %v2129_v31 = vadd.f32 %v847_v11, %v808_v2  ;;  %v2131_v57 = vadd.f32 %v847_v11, %v809_v7 }
 0x1a7   :  { %v2133_v36 = vadd.f32 %v847_v11, %v810_v20  ;;  %v2135_v56 = vadd.f32 %v847_v11, %v811_v25  ;;  %v2137_v5 = vadd.f32 %v847_v11, %v812_v41  ;;  %v2139_v61 = vadd.f32 %v847_v11, %v813_v47 }
 0x1a8   :  { %v2141_v15 = vadd.f32 %v847_v11, %v814_v0  ;;  %v2143_v50 = vadd.f32 %v847_v11, %v815_v6  ;;  %v2145_v32 = vadd.f32 %v847_v11, %v816_v23  ;;  %v2147_v35 = vadd.f32 %v847_v11, %v817_v29 }
 0x1a9   :  { %v2149_v48 = vadd.f32 %v847_v11, %v818_v51  ;;  %v2151_v53 = vadd.f32 %v847_v11, %v819_v59  ;;  %v2153_v2 = vadd.f32 %v847_v11, %v820_v16  ;;  %v2155_v7 = vadd.f32 %v847_v11, %v821_v26 }
 0x1aa   :  { %v2157_v20 = vadd.f32 %v847_v11, %v822_v52  ;;  %v2159_v25 = vadd.f32 %v847_v11, %v823_v62  ;;  %v2161_v41 = vadd.f32 %v847_v11, %v824_v27  ;;  %v2163_v47 = vadd.f32 %v847_v11, %v825_v39 }
 0x1ab   :  { %v2165_v0 = vadd.f32 %v847_v11, %v826_v10  ;;  %v2167_v6 = vadd.f32 %v847_v11, %v827_v49  ;;  %v2169_v23 = vadd.f32 %v847_v11, %v828_v8  ;;  %v2171_v29 = vadd.f32 %v847_v11, %v829_v28 }
 0x1ac   :  { %v2173_v51 = vadd.f32 %v847_v11, %v830_v40  ;;  %v2175_v59 = vadd.f32 %v847_v11, %v831_v45  ;;  %v2177_v16 = vadd.f32 %v847_v11, %v832_v58  ;;  %v2179_v26 = vadd.f32 %v847_v11, %v833_v63 }
 0x1ad   :  { %v2181_v52 = vadd.f32 %v847_v11, %v834_v12  ;;  %v2183_v62 = vadd.f32 %v847_v11, %v835_v17  ;;  %v2185_v27 = vadd.f32 %v847_v11, %v836_v30  ;;  %v2187_v39 = vadd.f32 %v847_v11, %v837_v37 }
 0x1ae   :  { %v2189_v10 = vadd.f32 %v847_v11, %v838_v54  ;;  %v2191_v49 = vadd.f32 %v847_v11, %v839_v60  ;;  %v2193_v8 = vadd.f32 %v847_v11, %v840_v13  ;;  %v2195_v28 = vadd.f32 %v847_v11, %v841_v19 }
 0x1af   :  { %v2197_v40 = vadd.f32 %v847_v11, %v842_v38  ;;  %v898_v45 = vmax.f32 %v2101_v46, 0.0  ;;  %v899_v58 = vmax.f32 %v2103_v18, 0.0  ;;  %v900_v63 = vmax.f32 %v2105_v33, 0.0 }
 0x1b0   :  { %v901_v12 = vmax.f32 %v2107_v43, 0.0  ;;  %v902_v17 = vmax.f32 %v2109_v24, 0.0  ;;  %v903_v30 = vmax.f32 %v2111_v1, 0.0  ;;  %v904_v37 = vmax.f32 %v2113_v55, 0.0 }
 0x1b1   :  { %v905_v54 = vmax.f32 %v2115_v44, 0.0  ;;  %v906_v60 = vmax.f32 %v2117_v21, 0.0  ;;  %v907_v13 = vmax.f32 %v2119_v34, 0.0  ;;  %v908_v14 = vmax.f32 %v2121_v9, 0.0 }
 0x1b2   :  { %v909_v19 = vmax.f32 %v2123_v3, 0.0  ;;  %v910_v4 = vmax.f32 %v2125_v42, 0.0  ;;  %v911_v38 = vmax.f32 %v2127_v22, 0.0  ;;  %v912_v11 = vmax.f32 %v2129_v31, 0.0 }
 0x1b3   :  { %v913_v46 = vmax.f32 %v2131_v57, 0.0  ;;  %v914_v18 = vmax.f32 %v2133_v36, 0.0  ;;  %v915_v33 = vmax.f32 %v2135_v56, 0.0  ;;  %v916_v43 = vmax.f32 %v2137_v5, 0.0 }
 0x1b4   :  { %v917_v24 = vmax.f32 %v2139_v61, 0.0  ;;  %v918_v1 = vmax.f32 %v2141_v15, 0.0  ;;  %v919_v55 = vmax.f32 %v2143_v50, 0.0  ;;  %v942_v61 = vmax.f32 %v2189_v10, 0.0 }
 0x1b5   :  { %v943_v15 = vmax.f32 %v2191_v49, 0.0  ;;  %v944_v50 = vmax.f32 %v2193_v8, 0.0  ;;  %v945_v42 = vmax.f32 %v2195_v28, 0.0  ;;  %v946_v22 = vmax.f32 %v2197_v40, 0.0 }
 0x1b6   :  { %v1299_v3 = vpack.c.bf16 %v898_v45, %v898_v45  ;;  %v1300_v31 = vpack.c.bf16 %v899_v58, %v899_v58  ;;  %v1301_v9 = vpack.c.bf16 %v900_v63, %v900_v63  ;;  %v1302_v57 = vpack.c.bf16 %v901_v12, %v901_v12 }
 0x1b7   :  { %v1303_v34 = vpack.c.bf16 %v902_v17, %v902_v17  ;;  %v1304_v36 = vpack.c.bf16 %v903_v30, %v903_v30  ;;  %v1305_v21 = vpack.c.bf16 %v904_v37, %v904_v37  ;;  %v1306_v56 = vpack.c.bf16 %v905_v54, %v905_v54 }
 0x1b8   :  { %v1307_v44 = vpack.c.bf16 %v906_v60, %v906_v60  ;;  %v1308_v5 = vpack.c.bf16 %v907_v13, %v907_v13  ;;  %1145 = vst.msk [vmem:[%s2529_s4] sm:$0xf] %vm1144_vm5, %v1299_v3  ;;  %1146 = vst.msk [vmem:[%s2529_s4 + $0x4] sm:$0xf] %vm1144_vm5, %v1300_v31  ;;  %v1309_v45 = vpack.c.bf16 %v908_v14, %v908_v14  ;;  %v2571_v3 = vmax.f32 %v2167_v6, 0.0 }
 0x1b9   :  { %v1310_v58 = vpack.c.bf16 %v909_v19, %v909_v19  ;;  %v1311_v63 = vpack.c.bf16 %v910_v4, %v910_v4  ;;  %v1312_v12 = vpack.c.bf16 %v911_v38, %v911_v38  ;;  %1147 = vst.msk [vmem:[%s2529_s4 + $0x8] sm:$0xf] %vm1144_vm5, %v1301_v9  ;;  %1148 = vst.msk [vmem:[%s2529_s4 + $0xc] sm:$0xf] %vm1144_vm5, %v1302_v57  ;;  %v2560_v4 = vmax.f32 %v2145_v32, 0.0 }
 0x1ba   :  { %1149 = vst.msk [vmem:[%s2529_s4 + $0x10] sm:$0xf] %vm1144_vm5, %v1303_v34  ;;  %1150 = vst.msk [vmem:[%s2529_s4 + $0x14] sm:$0xf] %vm1144_vm5, %v1304_v36  ;;  %v1313_v17 = vpack.c.bf16 %v912_v11, %v912_v11  ;;  %v1314_v30 = vpack.c.bf16 %v913_v46, %v913_v46  ;;  %v1315_v37 = vpack.c.bf16 %v914_v18, %v914_v18  ;;  %v2561_v11 = vmax.f32 %v2147_v35, 0.0 }
 0x1bb   :  { %v1316_v54 = vpack.c.bf16 %v915_v33, %v915_v33  ;;  %1151 = vst.msk [vmem:[%s2529_s4 + $0x18] sm:$0xf] %vm1144_vm5, %v1305_v21  ;;  %1152 = vst.msk [vmem:[%s2529_s4 + $0x1c] sm:$0xf] %vm1144_vm5, %v1306_v56  ;;  %v1317_v60 = vpack.c.bf16 %v916_v43, %v916_v43  ;;  %v1318_v13 = vpack.c.bf16 %v917_v24, %v917_v24  ;;  %v2562_v18 = vmax.f32 %v2149_v48, 0.0 }
 0x1bc   :  { %1153 = vst.msk [vmem:[%s2529_s4 + $0x20] sm:$0xf] %vm1144_vm5, %v1307_v44  ;;  %1154 = vst.msk [vmem:[%s2529_s4 + $0x24] sm:$0xf] %vm1144_vm5, %v1308_v5  ;;  %v1319_v14 = vpack.c.bf16 %v918_v1, %v918_v1  ;;  %v1320_v19 = vpack.c.bf16 %v919_v55, %v919_v55  ;;  %v1321_v38 = vpack.c.bf16 %v2560_v4, %v2560_v4  ;;  %v2563_v43 = vmax.f32 %v2151_v53, 0.0 }
 0x1bd   :  { %1155 = vst.msk [vmem:[%s2529_s4 + $0x28] sm:$0xf] %vm1144_vm5, %v1309_v45  ;;  %1156 = vst.msk [vmem:[%s2529_s4 + $0x2c] sm:$0xf] %vm1144_vm5, %v1310_v58  ;;  %v1322_v46 = vpack.c.bf16 %v2561_v11, %v2561_v11  ;;  %v1323_v33 = vpack.c.bf16 %v2562_v18, %v2562_v18  ;;  %v2564_v32 = vmax.f32 %v2153_v2, 0.0  ;;  %v2565_v48 = vmax.f32 %v2155_v7, 0.0 }
 0x1be   :  { %1157 = vst.msk [vmem:[%s2529_s4 + $0x30] sm:$0xf] %vm1144_vm5, %v1311_v63  ;;  %1158 = vst.msk [vmem:[%s2529_s4 + $0x34] sm:$0xf] %vm1144_vm5, %v1312_v12  ;;  %v1324_v24 = vpack.c.bf16 %v2563_v43, %v2563_v43  ;;  %v2566_v1 = vmax.f32 %v2157_v20, 0.0  ;;  %v2567_v44 = vmax.f32 %v2159_v25, 0.0  ;;  %v1332_v31 = vpack.c.bf16 %v2571_v3, %v2571_v3 }
 0x1bf   :  { %1159 = vst.msk [vmem:[%s2529_s4 + $0x38] sm:$0xf] %vm1144_vm5, %v1313_v17  ;;  %1160 = vst.msk [vmem:[%s2529_s4 + $0x3c] sm:$0xf] %vm1144_vm5, %v1314_v30  ;;  %v1325_v35 = vpack.c.bf16 %v2564_v32, %v2564_v32  ;;  %v1326_v53 = vpack.c.bf16 %v2565_v48, %v2565_v48  ;;  %v2568_v2 = vmax.f32 %v2161_v41, 0.0  ;;  %v2569_v20 = vmax.f32 %v2163_v47, 0.0 }
 0x1c0   :  { %1161 = vst.msk [vmem:[%s2529_s4 + $0x40] sm:$0xf] %vm1144_vm5, %v1315_v37  ;;  %1162 = vst.msk [vmem:[%s2529_s4 + $0x44] sm:$0xf] %vm1144_vm5, %v1316_v54  ;;  %v1327_v55 = vpack.c.bf16 %v2566_v1, %v2566_v1  ;;  %v1328_v21 = vpack.c.bf16 %v2567_v44, %v2567_v44  ;;  %v2570_v34 = vmax.f32 %v2165_v0, 0.0  ;;  %v2572_v41 = vmax.f32 %v2169_v23, 0.0 }
 0x1c1   :  { %1163 = vst.msk [vmem:[%s2529_s4 + $0x48] sm:$0xf] %vm1144_vm5, %v1317_v60  ;;  %1164 = vst.msk [vmem:[%s2529_s4 + $0x4c] sm:$0xf] %vm1144_vm5, %v1318_v13  ;;  %v1329_v7 = vpack.c.bf16 %v2568_v2, %v2568_v2  ;;  %v1330_v25 = vpack.c.bf16 %v2569_v20, %v2569_v20  ;;  %v2573_v0 = vmax.f32 %v2171_v29, 0.0  ;;  %v2574_v57 = vmax.f32 %v2173_v51, 0.0 }
 0x1c2   :  { %1165 = vst.msk [vmem:[%s2529_s4 + $0x50] sm:$0xf] %vm1144_vm5, %v1319_v14  ;;  %1166 = vst.msk [vmem:[%s2529_s4 + $0x54] sm:$0xf] %vm1144_vm5, %v1320_v19  ;;  %v1331_v9 = vpack.c.bf16 %v2570_v34, %v2570_v34  ;;  %v1333_v47 = vpack.c.bf16 %v2572_v41, %v2572_v41  ;;  %v2575_v56 = vmax.f32 %v2175_v59, 0.0  ;;  %v2576_v23 = vmax.f32 %v2177_v16, 0.0 }
 0x1c3   :  { %1167 = vst.msk [vmem:[%s2529_s4 + $0x58] sm:$0xf] %vm1144_vm5, %v1321_v38  ;;  %1168 = vst.msk [vmem:[%s2529_s4 + $0x5c] sm:$0xf] %vm1144_vm5, %v1322_v46  ;;  %v1334_v6 = vpack.c.bf16 %v2573_v0, %v2573_v0  ;;  %v1335_v36 = vpack.c.bf16 %v2574_v57, %v2574_v57  ;;  %v2577_v51 = vmax.f32 %v2179_v26, 0.0  ;;  %v2578_v45 = vmax.f32 %v2181_v52, 0.0 }
 0x1c4   :  { %1169 = vst.msk [vmem:[%s2529_s4 + $0x60] sm:$0xf] %vm1144_vm5, %v1323_v33  ;;  %1170 = vst.msk [vmem:[%s2529_s4 + $0x64] sm:$0xf] %vm1144_vm5, %v1324_v24  ;;  %v1336_v5 = vpack.c.bf16 %v2575_v56, %v2575_v56  ;;  %v1337_v29 = vpack.c.bf16 %v2576_v23, %v2576_v23  ;;  %v2579_v63 = vmax.f32 %v2183_v62, 0.0  ;;  %v2580_v16 = vmax.f32 %v2185_v27, 0.0 }
 0x1c5   :  { %1171 = vst.msk [vmem:[%s2529_s4 + $0x68] sm:$0xf] %vm1144_vm5, %v1325_v35  ;;  %1172 = vst.msk [vmem:[%s2529_s4 + $0x6c] sm:$0xf] %vm1144_vm5, %v1326_v53  ;;  %v1338_v59 = vpack.c.bf16 %v2577_v51, %v2577_v51  ;;  %v1339_v58 = vpack.c.bf16 %v2578_v45, %v2578_v45  ;;  %v2581_v52 = vmax.f32 %v2187_v39, 0.0  ;;  %v1343_v17 = vpack.c.bf16 %v942_v61, %v942_v61 }
 0x1c6   :  { %1173 = vst.msk [vmem:[%s2529_s4 + $0x70] sm:$0xf] %vm1144_vm5, %v1327_v55  ;;  %1174 = vst.msk [vmem:[%s2529_s4 + $0x74] sm:$0xf] %vm1144_vm5, %v1328_v21  ;;  %v1340_v12 = vpack.c.bf16 %v2579_v63, %v2579_v63  ;;  %v1341_v26 = vpack.c.bf16 %v2580_v16, %v2580_v16  ;;  %v1344_v30 = vpack.c.bf16 %v943_v15, %v943_v15 }
 0x1c7   :  { %1175 = vst.msk [vmem:[%s2529_s4 + $0x78] sm:$0xf] %vm1144_vm5, %v1329_v7  ;;  %1176 = vst.msk [vmem:[%s2529_s4 + $0x7c] sm:$0xf] %vm1144_vm5, %v1330_v25  ;;  %v1342_v62 = vpack.c.bf16 %v2581_v52, %v2581_v52  ;;  %v1345_v27 = vpack.c.bf16 %v944_v50, %v944_v50  ;;  %v1346_v39 = vpack.c.bf16 %v945_v42, %v945_v42 }
 0x1c8   :  { %1177 = vst.msk [vmem:[%s2529_s4 + $0x80] sm:$0xf] %vm1144_vm5, %v1331_v9  ;;  %1178 = vst.msk [vmem:[%s2529_s4 + $0x84] sm:$0xf] %vm1144_vm5, %v1332_v31  ;;  %v1347_v10 = vpack.c.bf16 %v946_v22, %v946_v22 }
 0x1c9   :  { %1179 = vst.msk [vmem:[%s2529_s4 + $0x88] sm:$0xf] %vm1144_vm5, %v1333_v47  ;;  %1180 = vst.msk [vmem:[%s2529_s4 + $0x8c] sm:$0xf] %vm1144_vm5, %v1334_v6 }
 0x1ca   :  { %1181 = vst.msk [vmem:[%s2529_s4 + $0x90] sm:$0xf] %vm1144_vm5, %v1335_v36  ;;  %1182 = vst.msk [vmem:[%s2529_s4 + $0x94] sm:$0xf] %vm1144_vm5, %v1336_v5 }
 0x1cb   :  { %1183 = vst.msk [vmem:[%s2529_s4 + $0x98] sm:$0xf] %vm1144_vm5, %v1337_v29  ;;  %1184 = vst.msk [vmem:[%s2529_s4 + $0x9c] sm:$0xf] %vm1144_vm5, %v1338_v59 }
 0x1cc   :  { %1185 = vst.msk [vmem:[%s2529_s4 + $0xa0] sm:$0xf] %vm1144_vm5, %v1339_v58  ;;  %1186 = vst.msk [vmem:[%s2529_s4 + $0xa4] sm:$0xf] %vm1144_vm5, %v1340_v12 }
 0x1cd   :  { %1187 = vst.msk [vmem:[%s2529_s4 + $0xa8] sm:$0xf] %vm1144_vm5, %v1341_v26  ;;  %1188 = vst.msk [vmem:[%s2529_s4 + $0xac] sm:$0xf] %vm1144_vm5, %v1342_v62 }
 0x1ce   :  { %1189 = vst.msk [vmem:[%s2529_s4 + $0xb0] sm:$0xf] %vm1144_vm5, %v1343_v17  ;;  %1190 = vst.msk [vmem:[%s2529_s4 + $0xb4] sm:$0xf] %vm1144_vm5, %v1344_v30 }
 0x1cf   :  { %1191 = vst.msk [vmem:[%s2529_s4 + $0xb8] sm:$0xf] %vm1144_vm5, %v1345_v27  ;;  %1192 = vst.msk [vmem:[%s2529_s4 + $0xbc] sm:$0xf] %vm1144_vm5, %v1346_v39 }
 0x1d0   :  { %1193 = vst.msk [vmem:[%s2529_s4 + $0xc0] sm:$0xf] %vm1144_vm5, %v1347_v10 }

// kernel: _lambda_.5
= control target key start
LH: loop header
LB: loop body
LE: loop exit
PB: predicated region body
PF: predicated region fallthrough
CT: control target
= control target key end

     0   :  { %vm419_vm0 = vcmask 523264   ;;  %vm635_vm1 = vcmask 517120   ;;  %vm744_vm2 = vcmask 519168   ;;  %vm751_vm3 = vcmask 516096   ;;  %s1285_s1 = inlined_call_operand.vmem [shape: bf16[576,64], index: 1, kind: input, shape index: {}]   ;;  %s1286_s0 = inlined_call_operand.vmem [shape: bf16[50,576], index: 0, kind: input, shape index: {}]   ;;  %s1287_s2 = inlined_call_operand.vmem [shape: f32[1,64], index: 2, kind: input, shape index: {}]   ;;  %s1288_s3 = inlined_call_operand.vmem [shape: f32[1,64], index: 3, kind: input, shape index: {}]   ;;  %s1289_s4 = inlined_call_operand.vmem [shape: bf16[50,64], index: 4, kind: output, shape index: {}]  }
   0x1   :  { %v943_v0 = vld [vmem:[%s1285_s1 + $0x40] sm:$0xff]   ;;  %v947_v4 = vld [vmem:[%s1285_s1 + $0x48] sm:$0xff]   ;;  %v951_v8 = vld [vmem:[%s1285_s1 + $0x50] sm:$0xff]  }
   0x2   :  { %v944_v1 = vld [vmem:[%s1285_s1 + $0xc0] sm:$0xff]   ;;  %831 = vmatprep.subr.bf16.mxu0 %v943_v0  ;;  %v948_v5 = vld [vmem:[%s1285_s1 + $0xc8] sm:$0xff]   ;;  %v952_v9 = vld [vmem:[%s1285_s1 + $0xd0] sm:$0xff]  }
   0x3   :  { %v945_v2 = vld [vmem:[%s1285_s1] sm:$0xff]   ;;  %871 = vmatprep.subr.bf16.mxu1 %v944_v1  ;;  %v949_v6 = vld [vmem:[%s1285_s1 + $0x8] sm:$0xff]   ;;  %v953_v10 = vld [vmem:[%s1285_s1 + $0x10] sm:$0xff]  }
   0x4   :  { %v946_v3 = vld [vmem:[%s1285_s1 + $0x80] sm:$0xff]   ;;  %832 = vmatpush3.bf16.msra.mxu0 %v945_v2  ;;  %v950_v7 = vld [vmem:[%s1285_s1 + $0x88] sm:$0xff]   ;;  %v954_v11 = vld [vmem:[%s1285_s1 + $0x90] sm:$0xff]  }
   0x5   :  { %872 = vmatpush3.bf16.msra.mxu1 %v946_v3  ;;  %833 = vmatprep.subr.bf16.mxu0 %v947_v4  ;;  %v955_v12 = vld [vmem:[%s1285_s1 + $0x58] sm:$0xff]   ;;  %v959_v16 = vld [vmem:[%s1285_s1 + $0x60] sm:$0xff]   ;;  %v963_v20 = vld [vmem:[%s1285_s1 + $0x68] sm:$0xff]  }
   0x6   :  { %873 = vmatprep.subr.bf16.mxu1 %v948_v5  ;;  %v956_v13 = vld [vmem:[%s1285_s1 + $0xd8] sm:$0xff]   ;;  %v960_v17 = vld [vmem:[%s1285_s1 + $0xe0] sm:$0xff]   ;;  %v964_v21 = vld [vmem:[%s1285_s1 + $0xe8] sm:$0xff]  }
   0x7   :  { %v957_v14 = vld [vmem:[%s1285_s1 + $0x18] sm:$0xff]   ;;  %v961_v18 = vld [vmem:[%s1285_s1 + $0x20] sm:$0xff]   ;;  %v965_v22 = vld [vmem:[%s1285_s1 + $0x28] sm:$0xff]  }
   0x8   :  { %834 = vmatpush3.bf16.msra.mxu0 %v949_v6  ;;  %v958_v15 = vld [vmem:[%s1285_s1 + $0x98] sm:$0xff]   ;;  %v962_v19 = vld [vmem:[%s1285_s1 + $0xa0] sm:$0xff]   ;;  %v966_v23 = vld [vmem:[%s1285_s1 + $0xa8] sm:$0xff]  }
   0x9   :  { %874 = vmatpush3.bf16.msra.mxu1 %v950_v7  ;;  %835 = vmatprep.subr.bf16.mxu0 %v951_v8  ;;  %v967_v24 = vld [vmem:[%s1285_s1 + $0x70] sm:$0xff]   ;;  %v971_v28 = vld [vmem:[%s1285_s1 + $0x78] sm:$0xff]   ;;  %v980_v35 = vld [vmem:[%s1286_s0 + $0xc] ss:$20 sps:$4 sm:$0xff]  }
   0xa   :  { %875 = vmatprep.subr.bf16.mxu1 %v952_v9  ;;  %v968_v25 = vld [vmem:[%s1285_s1 + $0xf0] sm:$0xff]   ;;  %v972_v29 = vld [vmem:[%s1285_s1 + $0xf8] sm:$0xff]   ;;  %v981_v36 = vld [vmem:[%s1285_s1 + $0x100] sm:$0xff]   ;;  %528 = vmatprep.mubr.bf16.mxu1 %v980_v35 }
   0xb   :  { %v969_v26 = vld [vmem:[%s1285_s1 + $0x30] sm:$0xff]   ;;  %v973_v30 = vld [vmem:[%s1285_s1 + $0x38] sm:$0xff]   ;;  %v982_v37 = vld [vmem:[%s1286_s0 + $0x2c] ss:$20 sps:$4 sm:$0xff]  }
   0xc   :  { %836 = vmatpush3.bf16.msra.mxu0 %v953_v10  ;;  %v970_v27 = vld [vmem:[%s1285_s1 + $0xb0] sm:$0xff]   ;;  %v974_v31 = vld [vmem:[%s1285_s1 + $0xb8] sm:$0xff]   ;;  %v988_v39 = vld [vmem:[%s1285_s1 + $0x108] sm:$0xff]  }
   0xd   :  { %876 = vmatpush3.bf16.msra.mxu1 %v954_v11  ;;  %837 = vmatprep.subr.bf16.mxu0 %v955_v12  ;;  %v975_v32 = vld [vmem:[%s1286_s0] ss:$20 sps:$4 sm:$0xff]   ;;  %v977_v33 = vld [vmem:[%s1286_s0 + $0x4] ss:$20 sps:$4 sm:$0xff]   ;;  %v978_v34 = vld [vmem:[%s1286_s0 + $0x8] ss:$20 sps:$4 sm:$0xff]  }
   0xe   :  { %877 = vmatprep.subr.bf16.mxu1 %v956_v13  ;;  %464 = vmatprep.mubr.bf16.mxu0 %v977_v33  ;;  %v984_v38 = vld [vmem:[%s1286_s0 + $0x34] ss:$20 sps:$4 sm:$0xff]   ;;  %v987_v41 = vld [vmem:[%s1286_s0 + $0x30] ss:$20 sps:$4 sm:$0xff]   ;;  %v1000_v45 = vld [vmem:[%s1285_s1 + $0x118] sm:$0xff]  }
   0xf   :  { %v986_v40 = vld [vmem:[%s1286_s0 + $0x28] ss:$20 sps:$4 sm:$0xff]   ;;  %v995_v44 = vld [vmem:[%s1285_s1 + $0x110] sm:$0xff]   ;;  %v37_v47 = vld [vmem:[%s1286_s0 + $0x80] sm:$0x11] }
  0x10   :  { %838 = vmatpush3.bf16.msra.mxu0 %v957_v14  ;;  %v989_v42 = vld [vmem:[%s1286_s0 + $0x54] ss:$20 sps:$4 sm:$0xff]   ;;  %v991_v43 = vld [vmem:[%s1286_s0 + $0x5c] ss:$20 sps:$4 sm:$0xff]   ;;  %v994_v49 = vld [vmem:[%s1286_s0 + $0x58] ss:$20 sps:$4 sm:$0xff]   ;;  %v775_v51 = vcombine.high %v37_v47, %v37_v47  ;;  %v774_v53 = vcombine.low %v37_v47, %v37_v47 }
  0x11   :  { %878 = vmatpush3.bf16.msra.mxu1 %v958_v15  ;;  %839 = vmatprep.subr.bf16.mxu0 %v959_v16  ;;  %v36_v46 = vld [vmem:[%s1286_s0 + $0x78] sm:$0x11]  ;;  %v993_v48 = vld [vmem:[%s1286_s0 + $0x50] ss:$20 sps:$4 sm:$0xff]   ;;  %v1002_v55 = vld [vmem:[%s1286_s0 + $0x60] ss:$20 sps:$4 sm:$0xff]  }
  0x12   :  { %879 = vmatprep.subr.bf16.mxu1 %v960_v17  ;;  %v773_v50 = vcombine.high %v36_v46, %v36_v46  ;;  %v772_v52 = vcombine.low %v36_v46, %v36_v46  ;;  %v1001_v54 = vld [vmem:[%s1286_s0 + $0x10] ss:$20 sps:$4 sm:$0xff]   ;;  %v1003_v56 = vld [vmem:[%s1286_s0 + $0x38] ss:$20 sps:$4 sm:$0xff]  }
  0x13   :  { %v1004_v57 = vld [vmem:[%s1286_s0 + $0x88] ss:$0 sps:$4 sm:$0x11]  }
  0x14   :  { %840 = vmatpush3.bf16.msra.mxu0 %v961_v18 }
  0x15   :  { %880 = vmatpush3.bf16.msra.mxu1 %v962_v19  ;;  %841 = vmatprep.subr.bf16.mxu0 %v963_v20 }
  0x16   :  { %881 = vmatprep.subr.bf16.mxu1 %v964_v21 }
  0x18   :  { %842 = vmatpush3.bf16.msra.mxu0 %v965_v22 }
  0x19   :  { %882 = vmatpush3.bf16.msra.mxu1 %v966_v23  ;;  %843 = vmatprep.subr.bf16.mxu0 %v967_v24 }
  0x1a   :  { %883 = vmatprep.subr.bf16.mxu1 %v968_v25 }
  0x1c   :  { %844 = vmatpush3.bf16.msra.mxu0 %v969_v26 }
  0x1d   :  { %884 = vmatpush3.bf16.msra.mxu1 %v970_v27  ;;  %845 = vmatprep.subr.bf16.mxu0 %v971_v28 }
  0x1e   :  { %885 = vmatprep.subr.bf16.mxu1 %v972_v29 }
  0x20   :  { %846 = vmatpush3.bf16.msra.mxu0 %v973_v30 }
  0x21   :  { %886 = vmatpush3.bf16.msra.mxu1 %v974_v31  ;;  %919 = vmatprep.subr.bf16.mxu0 %v981_v36 }
  0x22   :  { %935 = vmatprep.subr.bf16.mxu1 %v981_v36 }
  0x23   :  { %465 = vmatmul.mubr.bf16.vlgmr.msra.gmra.mrb[0].mxu0 %v975_v32 }
  0x24   :  { %529 = vmatmul.mubr.bf16.vlgmr.msra.gmra.mrb[0].mxu1 %v978_v34  ;;  %920 = vmatpush3.bf16.msra.mxu0 %v981_v36 }
  0x25   :  { %472 = vmatprep.mubr.bf16.mxu0 %v982_v37  ;;  %536 = vmatprep.mubr.bf16.mxu1 %v984_v38 }
  0x26   :  { %939 = vmatpush3.bf16.msra.mxu1 %v981_v36  ;;  %921 = vmatprep.subr.bf16.mxu0 %v988_v39 }
  0x27   :  { %936 = vmatprep.subr.bf16.mxu1 %v988_v39 }
  0x28   :  { %922 = vmatpush3.bf16.msra.mxu0 %v988_v39 }
  0x29   :  { %923 = vmatprep.subr.bf16.mxu0 %v995_v44 }
  0x2a   :  { %940 = vmatpush3.bf16.msra.mxu1 %v988_v39 }
  0x2b   :  { %473 = vmatmul.mubr.bf16.gmra.mrb[4].mxu0 %v986_v40  ;;  %937 = vmatprep.subr.bf16.mxu1 %v995_v44 }
  0x2c   :  { %537 = vmatmul.mubr.bf16.gmra.mrb[4].mxu1 %v987_v41  ;;  %480 = vmatprep.mubr.bf16.mxu0 %v989_v42 }
  0x2d   :  { %544 = vmatprep.mubr.bf16.mxu1 %v991_v43  ;;  %924 = vmatpush3.bf16.msra.mxu0 %v995_v44 }
  0x2e   :  { %925 = vmatprep.subr.bf16.mxu0 %v1000_v45  ;;  %941 = vmatpush3.bf16.msra.mxu1 %v995_v44 }
  0x2f   :  { %938 = vmatprep.subr.bf16.mxu1 %v1000_v45 }
  0x31   :  { %926 = vmatpush3.bf16.msra.mxu0 %v1000_v45 }
  0x32   :  { %942 = vmatpush3.bf16.msra.mxu1 %v1000_v45 }
  0x33   :  { %481 = vmatmul.mubr.bf16.gmra.mrb[8].mxu0 %v993_v48 }
  0x34   :  { %545 = vmatmul.mubr.bf16.gmra.mrb[8].mxu1 %v994_v49  ;;  %488 = vmatprep.mubr.bf16.mxu0 %v773_v50 }
  0x35   :  { %552 = vmatprep.mubr.bf16.mxu1 %v775_v51 }
  0x3b   :  { %489 = vmatmul.mubr.bf16.gmra.mrb[12].mxu0 %v772_v52 }
  0x3c   :  { %553 = vmatmul.mubr.bf16.gmra.mrb[12].mxu1 %v774_v53  ;;  %927 = vmatprep.mubr.msk.bf16.mxu0 %vm419_vm0, %v1001_v54 }
  0x3d   :  { %931 = vmatprep.mubr.msk.bf16.mxu1 %vm419_vm0, %v1002_v55 }
  0x43   :  { %928 = vmatmul.mubr.msk.bf16.vlgmr.msra.gmra.mrb[16].mxu0 %vm419_vm0, %v1003_v56 }
  0x44   :  { %932 = vmatmul.mubr.msk.bf16.vlgmr.msra.gmra.mrb[16].mxu1 %vm419_vm0, %v1004_v57 }
  0xf6   :  { %v847_v58 = vpop.f32.mrb[0].mxu0 }
  0xf7   :  { %v887_v59 = vpop.f32.mrb[0].mxu1  ;;  %v848_v60 = vpop.f32.mrb[1].mxu0 }
  0xf8   :  { %v849_v61 = vadd.f32 %v848_v60, %v847_v58  ;;  %v888_v62 = vpop.f32.mrb[1].mxu1  ;;  %v850_v63 = vpop.f32.mrb[2].mxu0 }
  0xf9   :  { %v889_v0 = vadd.f32 %v888_v62, %v887_v59  ;;  %v890_v1 = vpop.f32.mrb[2].mxu1  ;;  %v851_v2 = vpop.f32.mrb[3].mxu0 }
  0xfa   :  { %v852_v3 = vadd.f32 %v851_v2, %v850_v63  ;;  %v891_v4 = vpop.f32.mrb[3].mxu1 }
  0xfb   :  { %v892_v5 = vadd.f32 %v891_v4, %v890_v1  ;;  %v531_v6 = vadd.f32 %v889_v0, %v849_v61 }
  0xfd   :  { %v534_v7 = vadd.f32 %v892_v5, %v852_v3 }
  0xfe   :  { %v853_v8 = vpop.f32.mrb[4].mxu0 }
  0xff   :  { %v893_v9 = vpop.f32.mrb[4].mxu1  ;;  %v854_v10 = vpop.f32.mrb[5].mxu0 }
 0x100   :  { %v855_v11 = vadd.f32 %v854_v10, %v853_v8  ;;  %v894_v12 = vpop.f32.mrb[5].mxu1  ;;  %v856_v13 = vpop.f32.mrb[6].mxu0 }
 0x101   :  { %v895_v14 = vadd.f32 %v894_v12, %v893_v9  ;;  %v896_v15 = vpop.f32.mrb[6].mxu1  ;;  %v857_v16 = vpop.f32.mrb[7].mxu0 }
 0x102   :  { %v858_v17 = vadd.f32 %v857_v16, %v856_v13  ;;  %v897_v18 = vpop.f32.mrb[7].mxu1 }
 0x103   :  { %v898_v19 = vadd.f32 %v897_v18, %v896_v15  ;;  %v539_v20 = vadd.f32 %v895_v14, %v855_v11 }
 0x105   :  { %v542_v21 = vadd.f32 %v898_v19, %v858_v17 }
 0x106   :  { %v859_v22 = vpop.f32.mrb[8].mxu0 }
 0x107   :  { %v899_v23 = vpop.f32.mrb[8].mxu1  ;;  %v860_v24 = vpop.f32.mrb[9].mxu0 }
 0x108   :  { %v861_v25 = vadd.f32 %v860_v24, %v859_v22  ;;  %v900_v26 = vpop.f32.mrb[9].mxu1  ;;  %v862_v27 = vpop.f32.mrb[10].mxu0 }
 0x109   :  { %v901_v28 = vadd.f32 %v900_v26, %v899_v23  ;;  %v902_v29 = vpop.f32.mrb[10].mxu1  ;;  %v863_v30 = vpop.f32.mrb[11].mxu0 }
 0x10a   :  { %v864_v31 = vadd.f32 %v863_v30, %v862_v27  ;;  %v903_v32 = vpop.f32.mrb[11].mxu1 }
 0x10b   :  { %v904_v33 = vadd.f32 %v903_v32, %v902_v29  ;;  %v547_v34 = vadd.f32 %v901_v28, %v861_v25 }
 0x10d   :  { %v550_v35 = vadd.f32 %v904_v33, %v864_v31 }
 0x10e   :  { %v865_v36 = vpop.f32.mrb[12].mxu0 }
 0x10f   :  { %v905_v37 = vpop.f32.mrb[12].mxu1  ;;  %v866_v38 = vpop.f32.mrb[13].mxu0 }
 0x110   :  { %v867_v39 = vadd.f32 %v866_v38, %v865_v36  ;;  %v906_v40 = vpop.f32.mrb[13].mxu1  ;;  %v868_v41 = vpop.f32.mrb[14].mxu0 }
 0x111   :  { %v907_v42 = vadd.f32 %v906_v40, %v905_v37  ;;  %v869_v43 = vpop.f32.mrb[15].mxu0  ;;  %v908_v44 = vpop.f32.mrb[14].mxu1 }
 0x112   :  { %v909_v45 = vpop.f32.mrb[15].mxu1 }
 0x113   :  { %v555_v46 = vadd.f32 %v907_v42, %v867_v39 }
 0x116   :  { %v929_v47 = vpop.f32.mrb[16].mxu0 }
 0x117   :  { %v1198_v48 = vadd.f32 %v929_v47, %v539_v20  ;;  %v933_v49 = vpop.f32.mrb[16].mxu1  ;;  %v594_v50 = vpop.f32.mrb[17].mxu0 }
 0x118   :  { %v1200_v51 = vadd.f32 %v933_v49, %v555_v46  ;;  %v1202_v52 = vadd.f32 %v594_v50, %v531_v6  ;;  %v610_v53 = vpop.f32.mrb[17].mxu1  ;;  %v930_v54 = vpop.f32.mrb[18].mxu0  ;;  %v683_v50 = vlaneseq }
 0x119   :  { %v1204_v55 = vadd.f32 %v610_v53, %v547_v34  ;;  %v1206_v56 = vadd.f32 %v930_v54, %v542_v21  ;;  %v934_v57 = vpop.f32.mrb[18].mxu1  ;;  %v597_v58 = vpop.f32.mrb[19].mxu0  ;;  %v647_v63 = vmul.f32 %v1198_v48, %v1198_v48  ;;  %v627_v4 = vsel %vm419_vm0, %v1198_v48, 0.0  ;;  %v675_v54 = vld [vmem:[%s1287_s2] sm:$0x1] }
 0x11a   :  { %v613_v59 = vpop.f32.mrb[19].mxu1  ;;  %v645_v60 = vmul.f32 %v1202_v52, %v1202_v52  ;;  %v1210_v61 = vadd.f32 %v597_v58, %v534_v7  ;;  %v624_v0 = vsel %vm419_vm0, %v1202_v52, 0.0  ;;  %v651_v20 = vmul.f32 %v1200_v51, %v1200_v51 }
 0x11b   :  { %v1212_v62 = vadd.f32 %v613_v59, %v550_v35  ;;  %v648_v6 = vmul.f32 %v1206_v56, %v1206_v56  ;;  %v655_v10 = vsel %vm419_vm0, %v647_v63, 0.0  ;;  %v649_v11 = vmul.f32 %v1204_v55, %v1204_v55 }
 0x11c   :  { %v625_v1 = vsel %vm419_vm0, %v1210_v61, 0.0  ;;  %v646_v2 = vmul.f32 %v1210_v61, %v1210_v61  ;;  %v652_v5 = vsel %vm419_vm0, %v645_v60, 0.0  ;;  %v629_v12 = vsel %vm419_vm0, %v1206_v56, 0.0  ;;  %v679_v60 = vld [vmem:[%s1288_s3] sm:$0x1] }
 0x11d   :  { %v626_v3 = vadd.f32 %v625_v1, %v624_v0  ;;  %v631_v15 = vsel %vm419_vm0, %v1204_v55, 0.0  ;;  %v657_v16 = vsel %vm419_vm0, %v648_v6, 0.0  ;;  %v650_v17 = vmul.f32 %v1212_v62, %v1212_v62 }
 0x11e   :  { %v653_v7 = vsel %vm419_vm0, %v646_v2, 0.0  ;;  %v659_v21 = vsel %vm419_vm0, %v649_v11, 0.0  ;;  %v633_v22 = vsel %vm419_vm0, %v1212_v62, 0.0  ;;  %v636_v25 = vsel %vm635_vm1, %v1200_v51, 0.0 }
 0x11f   :  { %v628_v8 = vadd.f32 %v627_v4, %v626_v3  ;;  %v654_v9 = vadd.f32 %v653_v7, %v652_v5  ;;  %v661_v26 = vsel %vm419_vm0, %v650_v17, 0.0  ;;  %v663_v29 = vsel %vm635_vm1, %v651_v20, 0.0 }
 0x120   :  { %v684_v53 = vshrl.u32 %v683_v50, 7 }
 0x121   :  { %v656_v13 = vadd.f32 %v655_v10, %v654_v9  ;;  %v630_v14 = vadd.f32 %v629_v12, %v628_v8 }
 0x122   :  { %v685_v57 = vsub.s32 0, %v684_v53 }
 0x123   :  { %v632_v18 = vadd.f32 %v631_v15, %v630_v14  ;;  %v658_v19 = vadd.f32 %v657_v16, %v656_v13 }
 0x125   :  { %v634_v23 = vadd.f32 %v633_v22, %v632_v18  ;;  %v660_v24 = vadd.f32 %v659_v21, %v658_v19 }
 0x127   :  { %v637_v27 = vadd.f32 %v636_v25, %v634_v23  ;;  %v662_v28 = vadd.f32 %v661_v26, %v660_v24 }
 0x129   :  { %v638_v30 = vrot.slane %v637_v27, 4  ;;  %v664_v31 = vadd.f32 %v663_v29, %v662_v28 }
 0x12b   :  { %v639_v32 = vadd.f32 %v638_v30, %v637_v27  ;;  %v665_v33 = vrot.slane %v664_v31, 4 }
 0x12d   :  { %v640_v34 = vrot.slane %v639_v32, 2  ;;  %v666_v35 = vadd.f32 %v665_v33, %v664_v31 }
 0x12f   :  { %v641_v36 = vadd.f32 %v640_v34, %v639_v32  ;;  %v667_v37 = vrot.slane %v666_v35, 2 }
 0x131   :  { %v642_v38 = vrot.slane %v641_v36, 1  ;;  %v668_v39 = vadd.f32 %v667_v37, %v666_v35 }
 0x133   :  { %v643_v40 = vadd.f32 %v642_v38, %v641_v36  ;;  %v669_v41 = vrot.slane %v668_v39, 1 }
 0x135   :  { %v644_v42 = vmul.f32 0.02, %v643_v40  ;;  %v670_v43 = vadd.f32 %v669_v41, %v668_v39 }
 0x137   :  { %v671_v44 = vmul.f32 0.02, %v670_v43  ;;  %v672_v45 = vmul.f32 %v644_v42, %v644_v42 }
 0x139   :  { %v673_v46 = vsub.f32 %v671_v44, %v672_v45 }
 0x13b   :  { %v674_v47 = vmax.f32 %v673_v46, 0.0 }
 0x13d   :  { %v676_v49 = vadd.f32 1e-05, %v674_v47 }
 0x13f   :  { %1005 = vrsqrt.f32 %v676_v49 }
 0x149   :  { %v1006_v58 = vpop.eup %1005 }
 0x14a   :  { %v678_v59 = vmul.f32 %v1006_v58, %v675_v54 }
 0x14c   :  { %v680_v63 = vmul.f32 %v678_v59, %v644_v42  ;;  %v686_v0 = vrot.slane %v678_v59, %v685_v57 }
 0x14e   :  { %v681_v1 = vsub.f32 %v679_v60, %v680_v63  ;;  %v688_v2 = vmul.f32 %v686_v0, %v1202_v52  ;;  %v689_v3 = vmul.f32 %v686_v0, %v1210_v61  ;;  %v690_v4 = vmul.f32 %v686_v0, %v1198_v48 }
 0x14f   :  { %v691_v5 = vmul.f32 %v686_v0, %v1206_v56  ;;  %v692_v6 = vmul.f32 %v686_v0, %v1204_v55  ;;  %v693_v7 = vmul.f32 %v686_v0, %v1212_v62  ;;  %v694_v8 = vmul.f32 %v686_v0, %v1200_v51 }
 0x150   :  { %v699_v9 = vrot.slane %v681_v1, %v685_v57 }
 0x152   :  { %v701_v10 = vadd.f32 %v699_v9, %v688_v2  ;;  %v702_v11 = vadd.f32 %v699_v9, %v689_v3  ;;  %v703_v12 = vadd.f32 %v699_v9, %v690_v4  ;;  %v704_v13 = vadd.f32 %v699_v9, %v691_v5 }
 0x153   :  { %v705_v14 = vadd.f32 %v699_v9, %v692_v6  ;;  %v706_v15 = vadd.f32 %v699_v9, %v693_v7  ;;  %v707_v52 = vadd.f32 %v699_v9, %v694_v8 }
 0x154   :  { %v708_v61 = vmax.f32 %v701_v10, 0.0  ;;  %v709_v16 = vmax.f32 %v702_v11, 0.0  ;;  %v710_v48 = vmax.f32 %v703_v12, 0.0  ;;  %v711_v17 = vmax.f32 %v704_v13, 0.0 }
 0x155   :  { %v712_v56 = vmax.f32 %v705_v14, 0.0  ;;  %v713_v18 = vmax.f32 %v706_v15, 0.0  ;;  %v714_v55 = vmax.f32 %v707_v52, 0.0 }
 0x156   :  { %v824_v62 = vpack.c.bf16 %v708_v61, %v708_v61  ;;  %v825_v19 = vpack.c.bf16 %v709_v16, %v709_v16  ;;  %v826_v51 = vpack.c.bf16 %v710_v48, %v710_v48  ;;  %v827_v20 = vpack.c.bf16 %v711_v17, %v711_v17 }
 0x157   :  { %v828_v21 = vpack.c.bf16 %v712_v56, %v712_v56  ;;  %v829_v22 = vpack.c.bf16 %v713_v18, %v713_v18  ;;  %v830_v23 = vpack.c.bf16 %v714_v55, %v714_v55 }
 0x158   :  { %745 = vst.msk [vmem:[%s1289_s4] sm:$0xf] %vm744_vm2, %v824_v62  ;;  %746 = vst.msk [vmem:[%s1289_s4 + $0x4] sm:$0xf] %vm744_vm2, %v825_v19 }
 0x159   :  { %747 = vst.msk [vmem:[%s1289_s4 + $0x8] sm:$0xf] %vm744_vm2, %v826_v51  ;;  %748 = vst.msk [vmem:[%s1289_s4 + $0xc] sm:$0xf] %vm744_vm2, %v827_v20 }
 0x15a   :  { %749 = vst.msk [vmem:[%s1289_s4 + $0x10] sm:$0xf] %vm744_vm2, %v828_v21  ;;  %750 = vst.msk [vmem:[%s1289_s4 + $0x14] sm:$0xf] %vm744_vm2, %v829_v22 }
 0x15b   :  { %752 = vst.msk [vmem:[%s1289_s4 + $0x18] sm:$0x1] %vm751_vm3, %v830_v23 }

// kernel: _lambda_.6
= control target key start
LH: loop header
LB: loop body
LE: loop exit
PB: predicated region body
PF: predicated region fallthrough
CT: control target
= control target key end

     0   :  { %v647_v36 = vmov 0.0   ;;  %vm648_vm0 = vmmov 0   ;;  %vm326_vm1 = vcmask 523264   ;;  %vm493_vm2 = vcmask 519168   ;;  %s803_s1 = inlined_call_operand.vmem [shape: bf16[576,64], index: 1, kind: input, shape index: {}]   ;;  %s804_s0 = inlined_call_operand.vmem [shape: bf16[8,576], index: 0, kind: input, shape index: {}]   ;;  %s805_s2 = inlined_call_operand.vmem [shape: f32[1,64], index: 2, kind: input, shape index: {}]   ;;  %s806_s3 = inlined_call_operand.vmem [shape: f32[1,64], index: 3, kind: input, shape index: {}]   ;;  %s807_s4 = inlined_call_operand.vmem [shape: bf16[8,64], index: 4, kind: output, shape index: {}]  }
   0x1   :  { %v604_v0 = vld [vmem:[%s803_s1 + $0x40] sm:$0xff]   ;;  %v608_v4 = vld [vmem:[%s803_s1 + $0x48] sm:$0xff]   ;;  %v612_v8 = vld [vmem:[%s803_s1 + $0x50] sm:$0xff]  }
   0x2   :  { %v605_v1 = vld [vmem:[%s803_s1 + $0xc0] sm:$0xff]   ;;  %541 = vmatprep.subr.bf16.mxu0 %v604_v0  ;;  %v609_v5 = vld [vmem:[%s803_s1 + $0xc8] sm:$0xff]   ;;  %v613_v9 = vld [vmem:[%s803_s1 + $0xd0] sm:$0xff]  }
   0x3   :  { %v606_v2 = vld [vmem:[%s803_s1] sm:$0xff]   ;;  %563 = vmatprep.subr.bf16.mxu1 %v605_v1  ;;  %v610_v6 = vld [vmem:[%s803_s1 + $0x8] sm:$0xff]   ;;  %v614_v10 = vld [vmem:[%s803_s1 + $0x10] sm:$0xff]  }
   0x4   :  { %v607_v3 = vld [vmem:[%s803_s1 + $0x80] sm:$0xff]   ;;  %542 = vmatpush3.bf16.msra.mxu0 %v606_v2  ;;  %v611_v7 = vld [vmem:[%s803_s1 + $0x88] sm:$0xff]   ;;  %v615_v11 = vld [vmem:[%s803_s1 + $0x90] sm:$0xff]  }
   0x5   :  { %564 = vmatpush3.bf16.msra.mxu1 %v607_v3  ;;  %543 = vmatprep.subr.bf16.mxu0 %v608_v4  ;;  %v616_v12 = vld [vmem:[%s803_s1 + $0x58] sm:$0xff]   ;;  %v620_v16 = vld [vmem:[%s803_s1 + $0x60] sm:$0xff]   ;;  %v624_v20 = vld [vmem:[%s803_s1 + $0x68] sm:$0xff]  }
   0x6   :  { %565 = vmatprep.subr.bf16.mxu1 %v609_v5  ;;  %v617_v13 = vld [vmem:[%s803_s1 + $0xd8] sm:$0xff]   ;;  %v621_v17 = vld [vmem:[%s803_s1 + $0xe0] sm:$0xff]   ;;  %v625_v21 = vld [vmem:[%s803_s1 + $0xe8] sm:$0xff]  }
   0x7   :  { %v618_v14 = vld [vmem:[%s803_s1 + $0x18] sm:$0xff]   ;;  %v622_v18 = vld [vmem:[%s803_s1 + $0x20] sm:$0xff]   ;;  %v626_v22 = vld [vmem:[%s803_s1 + $0x28] sm:$0xff]  }
   0x8   :  { %544 = vmatpush3.bf16.msra.mxu0 %v610_v6  ;;  %v619_v15 = vld [vmem:[%s803_s1 + $0x98] sm:$0xff]   ;;  %v623_v19 = vld [vmem:[%s803_s1 + $0xa0] sm:$0xff]   ;;  %v627_v23 = vld [vmem:[%s803_s1 + $0xa8] sm:$0xff]  }
   0x9   :  { %566 = vmatpush3.bf16.msra.mxu1 %v611_v7  ;;  %545 = vmatprep.subr.bf16.mxu0 %v612_v8  ;;  %v628_v24 = vld [vmem:[%s803_s1 + $0x70] sm:$0xff]   ;;  %v632_v28 = vld [vmem:[%s803_s1 + $0x78] sm:$0xff]   ;;  %v18_v32 = vld [vmem:[%s804_s0] sm:$0xff] }
   0xa   :  { %567 = vmatprep.subr.bf16.mxu1 %v613_v9  ;;  %v629_v25 = vld [vmem:[%s803_s1 + $0xf0] sm:$0xff]   ;;  %v633_v29 = vld [vmem:[%s803_s1 + $0xf8] sm:$0xff]   ;;  %v499_v33 = vcombine.low %v18_v32, %v18_v32  ;;  %v500_v34 = vcombine.high %v18_v32, %v18_v32  ;;  %v19_v35 = vld [vmem:[%s804_s0 + $0x8] sm:$0xff] }
   0xb   :  { %v630_v26 = vld [vmem:[%s803_s1 + $0x30] sm:$0xff]   ;;  %v634_v30 = vld [vmem:[%s803_s1 + $0x38] sm:$0xff]   ;;  %v501_v37 = vcombine.low %v19_v35, %v19_v35  ;;  %v502_v38 = vcombine.high %v19_v35, %v19_v35  ;;  %v641_v39 = vld [vmem:[%s803_s1 + $0x100] sm:$0xff]  }
   0xc   :  { %546 = vmatpush3.bf16.msra.mxu0 %v614_v10  ;;  %v631_v27 = vld [vmem:[%s803_s1 + $0xb0] sm:$0xff]   ;;  %v635_v31 = vld [vmem:[%s803_s1 + $0xb8] sm:$0xff]   ;;  %362 = vmatprep.mubr.bf16.mxu0 %v500_v34  ;;  %v642_v40 = vld [vmem:[%s803_s1 + $0x108] sm:$0xff]  }
   0xd   :  { %568 = vmatpush3.bf16.msra.mxu1 %v615_v11  ;;  %547 = vmatprep.subr.bf16.mxu0 %v616_v12  ;;  %v643_v41 = vld [vmem:[%s803_s1 + $0x110] sm:$0xff]   ;;  %v644_v42 = vld [vmem:[%s803_s1 + $0x118] sm:$0xff]  }
   0xe   :  { %569 = vmatprep.subr.bf16.mxu1 %v617_v13  ;;  %402 = vmatprep.mubr.bf16.mxu1 %v502_v38  ;;  %v638_v43 = vld [vmem:[%s804_s0 + $0x10] ss:$0 sps:$4 sm:$0xff]  }
  0x10   :  { %548 = vmatpush3.bf16.msra.mxu0 %v618_v14 }
  0x11   :  { %570 = vmatpush3.bf16.msra.mxu1 %v619_v15  ;;  %549 = vmatprep.subr.bf16.mxu0 %v620_v16 }
  0x12   :  { %571 = vmatprep.subr.bf16.mxu1 %v621_v17  ;;  %v478_v17 = vlaneseq }
  0x14   :  { %550 = vmatpush3.bf16.msra.mxu0 %v622_v18  ;;  %v479_v18 = vshrl.u32 %v478_v17, 7 }
  0x15   :  { %572 = vmatpush3.bf16.msra.mxu1 %v623_v19  ;;  %551 = vmatprep.subr.bf16.mxu0 %v624_v20  ;;  %v470_v19 = vld [vmem:[%s805_s2] sm:$0x1] }
  0x16   :  { %573 = vmatprep.subr.bf16.mxu1 %v625_v21  ;;  %v480_v20 = vsub.s32 0, %v479_v18 }
  0x18   :  { %552 = vmatpush3.bf16.msra.mxu0 %v626_v22 }
  0x19   :  { %574 = vmatpush3.bf16.msra.mxu1 %v627_v23  ;;  %553 = vmatprep.subr.bf16.mxu0 %v628_v24  ;;  %v474_v23 = vld [vmem:[%s806_s3] sm:$0x1] }
  0x1a   :  { %575 = vmatprep.subr.bf16.mxu1 %v629_v25 }
  0x1c   :  { %554 = vmatpush3.bf16.msra.mxu0 %v630_v26 }
  0x1d   :  { %576 = vmatpush3.bf16.msra.mxu1 %v631_v27  ;;  %555 = vmatprep.subr.bf16.mxu0 %v632_v28 }
  0x1e   :  { %577 = vmatprep.subr.bf16.mxu1 %v633_v29 }
  0x20   :  { %556 = vmatpush3.bf16.msra.mxu0 %v634_v30 }
  0x21   :  { %578 = vmatpush3.bf16.msra.mxu1 %v635_v31  ;;  %590 = vmatprep.subr.bf16.mxu0 %v647_v36 }
  0x23   :  { %363 = vmatmul.mubr.bf16.vlgmr.msra.gmra.mrb[0].mxu0 %v499_v33 }
  0x24   :  { %403 = vmatmul.mubr.bf16.vlgmr.msra.gmra.mrb[0].mxu1 %v501_v37  ;;  %591 = vmatpush3.bf16.msra.mxu0 %v641_v39 }
  0x25   :  { %592 = vmatprep.subr.bf16.mxu0 %v647_v36  ;;  %598 = vmatprep.mubr.msk.bf16.mxu0 %vm648_vm0, %v647_v36 }
  0x28   :  { %593 = vmatpush3.bf16.msra.mxu0 %v642_v40 }
  0x29   :  { %594 = vmatprep.subr.bf16.mxu0 %v647_v36 }
  0x2c   :  { %595 = vmatpush3.bf16.msra.mxu0 %v643_v41 }
  0x2d   :  { %596 = vmatprep.subr.bf16.mxu0 %v647_v36 }
  0x30   :  { %597 = vmatpush3.bf16.msra.mxu0 %v644_v42 }
  0x33   :  { %599 = vmatmul.mubr.msk.bf16.vlgmr.msra.gmra.mrb[4].mxu0 %vm326_vm1, %v638_v43 }
  0xf6   :  { %v557_v44 = vpop.f32.mrb[0].mxu0 }
  0xf7   :  { %v579_v45 = vpop.f32.mrb[0].mxu1  ;;  %v558_v46 = vpop.f32.mrb[1].mxu0 }
  0xf8   :  { %v559_v47 = vadd.f32 %v558_v46, %v557_v44  ;;  %v580_v48 = vpop.f32.mrb[1].mxu1  ;;  %v560_v49 = vpop.f32.mrb[2].mxu0 }
  0xf9   :  { %v581_v50 = vadd.f32 %v580_v48, %v579_v45  ;;  %v561_v51 = vpop.f32.mrb[3].mxu0  ;;  %v582_v52 = vpop.f32.mrb[2].mxu1 }
  0xfa   :  { %v583_v53 = vpop.f32.mrb[3].mxu1 }
  0xfb   :  { %v405_v54 = vadd.f32 %v581_v50, %v559_v47 }
 0x106   :  { %v444_v55 = vpop.f32.mrb[4].mxu0 }
 0x107   :  { %v445_v56 = vadd.f32 %v444_v55, %v405_v54  ;;  %v600_v57 = vpop.f32.mrb[5].mxu0 }
 0x108   :  { %v447_v58 = vpop.f32.mrb[6].mxu0 }
 0x109   :  { %v450_v59 = vsel %vm326_vm1, %v445_v56, 0.0  ;;  %v458_v60 = vmul.f32 %v445_v56, %v445_v56  ;;  %v601_v61 = vpop.f32.mrb[7].mxu0 }
 0x10a   :  { %v451_v62 = vrot.slane %v450_v59, 4 }
 0x10b   :  { %v459_v63 = vsel %vm326_vm1, %v458_v60, 0.0 }
 0x10c   :  { %v452_v0 = vadd.f32 %v451_v62, %v450_v59  ;;  %v460_v1 = vrot.slane %v459_v63, 4 }
 0x10e   :  { %v453_v2 = vrot.slane %v452_v0, 2  ;;  %v461_v3 = vadd.f32 %v460_v1, %v459_v63 }
 0x110   :  { %v454_v4 = vadd.f32 %v453_v2, %v452_v0  ;;  %v462_v5 = vrot.slane %v461_v3, 2 }
 0x112   :  { %v455_v6 = vrot.slane %v454_v4, 1  ;;  %v463_v7 = vadd.f32 %v462_v5, %v461_v3 }
 0x114   :  { %v456_v8 = vadd.f32 %v455_v6, %v454_v4  ;;  %v464_v9 = vrot.slane %v463_v7, 1 }
 0x116   :  { %v457_v10 = vmul.f32 0.125, %v456_v8  ;;  %v465_v11 = vadd.f32 %v464_v9, %v463_v7 }
 0x118   :  { %v466_v12 = vmul.f32 0.125, %v465_v11  ;;  %v467_v13 = vmul.f32 %v457_v10, %v457_v10 }
 0x11a   :  { %v468_v14 = vsub.f32 %v466_v12, %v467_v13 }
 0x11c   :  { %v469_v15 = vmax.f32 %v468_v14, 0.0 }
 0x11e   :  { %v471_v16 = vadd.f32 1e-05, %v469_v15 }
 0x120   :  { %645 = vrsqrt.f32 %v471_v16 }
 0x12a   :  { %v646_v21 = vpop.eup %645 }
 0x12b   :  { %v473_v22 = vmul.f32 %v646_v21, %v470_v19 }
 0x12d   :  { %v475_v24 = vmul.f32 %v473_v22, %v457_v10  ;;  %v481_v25 = vrot.slane %v473_v22, %v480_v20 }
 0x12f   :  { %v476_v26 = vsub.f32 %v474_v23, %v475_v24  ;;  %v483_v27 = vmul.f32 %v481_v25, %v445_v56 }
 0x131   :  { %v488_v28 = vrot.slane %v476_v26, %v480_v20 }
 0x133   :  { %v490_v29 = vadd.f32 %v488_v28, %v483_v27 }
 0x135   :  { %v491_v30 = vmax.f32 %v490_v29, 0.0 }
 0x137   :  { %v492_v31 = vpack.c.bf16 %v491_v30, %v491_v30 }
 0x139   :  { %494 = vst.msk [vmem:[%s807_s4] sm:$0xf] %vm493_vm2, %v492_v31 }

// kernel: _lambda_.7
= control target key start
LH: loop header
LB: loop body
LE: loop exit
PB: predicated region body
PF: predicated region fallthrough
CT: control target
= control target key end

     0   :  { %v681_v39 = vmov 0.0   ;;  %vm682_vm0 = vmmov 0   ;;  %s848_s0 = inlined_call_operand.vmem [shape: bf16[8,576], index: 0, kind: input, shape index: {}]   ;;  %s849_s1 = inlined_call_operand.vmem [shape: bf16[576,64], index: 1, kind: input, shape index: {}]   ;;  %s850_s2 = inlined_call_operand.vmem [shape: f32[1,64], index: 2, kind: input, shape index: {}]   ;;  %s851_s3 = inlined_call_operand.vmem [shape: f32[1,64], index: 3, kind: input, shape index: {}]   ;;  %s852_s4 = inlined_call_operand.hbm [shape: f32[8,64], index: 4, kind: output, shape index: {}]  }
   0x1   :  { %v614_v0 = vld [vmem:[%s849_s1 + $0x40] sm:$0xff]   ;;  %v618_v4 = vld [vmem:[%s849_s1 + $0x48] sm:$0xff]   ;;  %v622_v8 = vld [vmem:[%s849_s1 + $0x50] sm:$0xff]  }
   0x2   :  { %v615_v1 = vld [vmem:[%s849_s1 + $0xc0] sm:$0xff]   ;;  %550 = vmatprep.subr.bf16.mxu0 %v614_v0  ;;  %v619_v5 = vld [vmem:[%s849_s1 + $0xc8] sm:$0xff]   ;;  %v623_v9 = vld [vmem:[%s849_s1 + $0xd0] sm:$0xff]  }
   0x3   :  { %v616_v2 = vld [vmem:[%s849_s1] sm:$0xff]   ;;  %572 = vmatprep.subr.bf16.mxu1 %v615_v1  ;;  %v620_v6 = vld [vmem:[%s849_s1 + $0x8] sm:$0xff]   ;;  %v624_v10 = vld [vmem:[%s849_s1 + $0x10] sm:$0xff]  }
   0x4   :  { %v617_v3 = vld [vmem:[%s849_s1 + $0x80] sm:$0xff]   ;;  %551 = vmatpush3.bf16.msra.mxu0 %v616_v2  ;;  %v621_v7 = vld [vmem:[%s849_s1 + $0x88] sm:$0xff]   ;;  %v625_v11 = vld [vmem:[%s849_s1 + $0x90] sm:$0xff]  }
   0x5   :  { %573 = vmatpush3.bf16.msra.mxu1 %v617_v3  ;;  %552 = vmatprep.subr.bf16.mxu0 %v618_v4  ;;  %v626_v12 = vld [vmem:[%s849_s1 + $0x58] sm:$0xff]   ;;  %v630_v16 = vld [vmem:[%s849_s1 + $0x60] sm:$0xff]   ;;  %v634_v20 = vld [vmem:[%s849_s1 + $0x68] sm:$0xff]  }
   0x6   :  { %574 = vmatprep.subr.bf16.mxu1 %v619_v5  ;;  %v627_v13 = vld [vmem:[%s849_s1 + $0xd8] sm:$0xff]   ;;  %v631_v17 = vld [vmem:[%s849_s1 + $0xe0] sm:$0xff]   ;;  %v635_v21 = vld [vmem:[%s849_s1 + $0xe8] sm:$0xff]  }
   0x7   :  { %v628_v14 = vld [vmem:[%s849_s1 + $0x18] sm:$0xff]   ;;  %v632_v18 = vld [vmem:[%s849_s1 + $0x20] sm:$0xff]   ;;  %v636_v22 = vld [vmem:[%s849_s1 + $0x28] sm:$0xff]  }
   0x8   :  { %553 = vmatpush3.bf16.msra.mxu0 %v620_v6  ;;  %v629_v15 = vld [vmem:[%s849_s1 + $0x98] sm:$0xff]   ;;  %v633_v19 = vld [vmem:[%s849_s1 + $0xa0] sm:$0xff]   ;;  %v637_v23 = vld [vmem:[%s849_s1 + $0xa8] sm:$0xff]  }
   0x9   :  { %575 = vmatpush3.bf16.msra.mxu1 %v621_v7  ;;  %554 = vmatprep.subr.bf16.mxu0 %v622_v8  ;;  %v638_v24 = vld [vmem:[%s849_s1 + $0x70] sm:$0xff]   ;;  %v642_v28 = vld [vmem:[%s849_s1 + $0x78] sm:$0xff]   ;;  %v19_v32 = vld [vmem:[%s848_s0] sm:$0xff] }
   0xa   :  { %576 = vmatprep.subr.bf16.mxu1 %v623_v9  ;;  %v639_v25 = vld [vmem:[%s849_s1 + $0xf0] sm:$0xff]   ;;  %v643_v29 = vld [vmem:[%s849_s1 + $0xf8] sm:$0xff]   ;;  %v20_v33 = vld [vmem:[%s848_s0 + $0x8] sm:$0xff]  ;;  %v508_v34 = vcombine.low %v19_v32, %v19_v32  ;;  %v509_v35 = vcombine.high %v19_v32, %v19_v32 }
   0xb   :  { %v640_v26 = vld [vmem:[%s849_s1 + $0x30] sm:$0xff]   ;;  %v644_v30 = vld [vmem:[%s849_s1 + $0x38] sm:$0xff]   ;;  %v510_v36 = vcombine.low %v20_v33, %v20_v33  ;;  %v511_v37 = vcombine.high %v20_v33, %v20_v33  ;;  %v650_v38 = vld [vmem:[%s849_s1 + $0x100] sm:$0xff]  }
   0xc   :  { %555 = vmatpush3.bf16.msra.mxu0 %v624_v10  ;;  %v641_v27 = vld [vmem:[%s849_s1 + $0xb0] sm:$0xff]   ;;  %v645_v31 = vld [vmem:[%s849_s1 + $0xb8] sm:$0xff]   ;;  %363 = vmatprep.mubr.bf16.mxu0 %v509_v35  ;;  %v651_v40 = vld [vmem:[%s849_s1 + $0x108] sm:$0xff]  }
   0xd   :  { %577 = vmatpush3.bf16.msra.mxu1 %v625_v11  ;;  %556 = vmatprep.subr.bf16.mxu0 %v626_v12 }
   0xe   :  { %578 = vmatprep.subr.bf16.mxu1 %v627_v13  ;;  %403 = vmatprep.mubr.bf16.mxu1 %v511_v37 }
  0x10   :  { %557 = vmatpush3.bf16.msra.mxu0 %v628_v14 }
  0x11   :  { %579 = vmatpush3.bf16.msra.mxu1 %v629_v15  ;;  %558 = vmatprep.subr.bf16.mxu0 %v630_v16 }
  0x12   :  { %580 = vmatprep.subr.bf16.mxu1 %v631_v17 }
  0x14   :  { %559 = vmatpush3.bf16.msra.mxu0 %v632_v18 }
  0x15   :  { %581 = vmatpush3.bf16.msra.mxu1 %v633_v19  ;;  %560 = vmatprep.subr.bf16.mxu0 %v634_v20 }
  0x16   :  { %582 = vmatprep.subr.bf16.mxu1 %v635_v21 }
  0x18   :  { %561 = vmatpush3.bf16.msra.mxu0 %v636_v22 }
  0x19   :  { %583 = vmatpush3.bf16.msra.mxu1 %v637_v23  ;;  %562 = vmatprep.subr.bf16.mxu0 %v638_v24 }
  0x1a   :  { %584 = vmatprep.subr.bf16.mxu1 %v639_v25 }
  0x1c   :  { %563 = vmatpush3.bf16.msra.mxu0 %v640_v26 }
  0x1d   :  { %585 = vmatpush3.bf16.msra.mxu1 %v641_v27  ;;  %564 = vmatprep.subr.bf16.mxu0 %v642_v28 }
  0x1e   :  { %586 = vmatprep.subr.bf16.mxu1 %v643_v29 }
  0x20   :  { %565 = vmatpush3.bf16.msra.mxu0 %v644_v30 }
  0x21   :  { %587 = vmatpush3.bf16.msra.mxu1 %v645_v31  ;;  %599 = vmatprep.subr.bf16.mxu0 %v681_v39 }
  0x23   :  { %364 = vmatmul.mubr.bf16.vlgmr.msra.gmra.mrb[0].mxu0 %v508_v34 }
  0x24   :  { %404 = vmatmul.mubr.bf16.vlgmr.msra.gmra.mrb[0].mxu1 %v510_v36  ;;  %600 = vmatpush3.bf16.msra.mxu0 %v650_v38 }
  0x25   :  { %607 = vmatprep.mubr.msk.bf16.mxu0 %vm682_vm0, %v681_v39 }
  0x26   :  { %9 = vsyncpa [#allocation3], 0  ;;  %601 = vmatprep.subr.bf16.mxu0 %v681_v39  ;;  %v652_v41 = vld [vmem:[%s849_s1 + $0x110] sm:$0xff]   ;;  %v653_v42 = vld [vmem:[%s849_s1 + $0x118] sm:$0xff]   ;;  %vm327_vm1 = vcmask 523264   ;;  %v479_v17 = vlaneseq  ;;  %s683_s17 = smov [#allocation2]  }
  0x27   :  { %v654_v43 = vld [vmem:[%s848_s0 + $0x10] ss:$0 sps:$4 sm:$0xff]   ;;  %v471_v19 = vld [vmem:[%s850_s2] sm:$0x1]  ;;  %s500_s18 = sshll.u32 %s683_s17, 4  ;;  %s501_s18 = int_to_ptr.vmem [resolvable:$true] %s500_s18 }
  0x28   :  { %602 = vmatpush3.bf16.msra.mxu0 %v651_v40  ;;  %v480_v18 = vshrl.u32 %v479_v17, 7  ;;  %v475_v23 = vld [vmem:[%s851_s3] sm:$0x1]  ;;  %s657_s2 = scalar_lea.vmem %s501_s18, 128  ;;  %p662_p1 = scmp.lt.s32.totalorder %s501_s18, %s501_s18 }
  0x29   :  { %603 = vmatprep.subr.bf16.mxu0 %v681_v39  ;;  %p658_p0 = scmp.ne.s32.totalorder %s501_s18, %s657_s2  ;;  %p663_p2 = scmp.lt.s32.totalorder %s657_s2, %s657_s2 }
  0x2a   :  { %v481_v20 = vsub.s32 0, %v480_v18 }
  0x2b   :  { %p664_p3 = por %p663_p2, %p662_p1 }
  0x2c   :  { %604 = vmatpush3.bf16.msra.mxu0 %v652_v41 }
  0x2d   :  { %605 = vmatprep.subr.bf16.mxu0 %v681_v39  ;;  %p665_p4 = pnand %p664_p3, %p658_p0 }
  0x30   :  { %606 = vmatpush3.bf16.msra.mxu0 %v653_v42 }
  0x33   :  { %608 = vmatmul.mubr.msk.bf16.vlgmr.msra.gmra.mrb[4].mxu0 %vm327_vm1, %v654_v43 }
  0xf6   :  { %v566_v44 = vpop.f32.mrb[0].mxu0 }
  0xf7   :  { %v588_v45 = vpop.f32.mrb[0].mxu1  ;;  %v567_v46 = vpop.f32.mrb[1].mxu0 }
  0xf8   :  { %v589_v47 = vpop.f32.mrb[1].mxu1  ;;  %v568_v48 = vadd.f32 %v567_v46, %v566_v44  ;;  %v569_v50 = vpop.f32.mrb[2].mxu0 }
  0xf9   :  { %v590_v49 = vadd.f32 %v589_v47, %v588_v45  ;;  %v591_v51 = vpop.f32.mrb[2].mxu1  ;;  %v570_v52 = vpop.f32.mrb[3].mxu0 }
  0xfa   :  { %v592_v53 = vpop.f32.mrb[3].mxu1 }
  0xfb   :  { %v406_v54 = vadd.f32 %v590_v49, %v568_v48 }
 0x106   :  { %v445_v55 = vpop.f32.mrb[4].mxu0 }
 0x107   :  { %v446_v56 = vadd.f32 %v445_v55, %v406_v54  ;;  %v609_v57 = vpop.f32.mrb[5].mxu0 }
 0x108   :  { %v448_v58 = vpop.f32.mrb[6].mxu0 }
 0x109   :  { %v451_v59 = vsel %vm327_vm1, %v446_v56, 0.0  ;;  %v459_v60 = vmul.f32 %v446_v56, %v446_v56  ;;  %v610_v61 = vpop.f32.mrb[7].mxu0 }
 0x10a   :  { %v452_v62 = vrot.slane %v451_v59, 4 }
 0x10b   :  { %v460_v63 = vsel %vm327_vm1, %v459_v60, 0.0 }
 0x10c   :  { %v453_v0 = vadd.f32 %v452_v62, %v451_v59  ;;  %v461_v1 = vrot.slane %v460_v63, 4 }
 0x10e   :  { %v454_v2 = vrot.slane %v453_v0, 2  ;;  %v462_v3 = vadd.f32 %v461_v1, %v460_v63 }
 0x110   :  { %v455_v4 = vadd.f32 %v454_v2, %v453_v0  ;;  %v463_v5 = vrot.slane %v462_v3, 2 }
 0x112   :  { %v456_v6 = vrot.slane %v455_v4, 1  ;;  %v464_v7 = vadd.f32 %v463_v5, %v462_v3 }
 0x114   :  { %v457_v8 = vadd.f32 %v456_v6, %v455_v4  ;;  %v465_v9 = vrot.slane %v464_v7, 1 }
 0x116   :  { %v458_v10 = vmul.f32 0.125, %v457_v8  ;;  %v466_v11 = vadd.f32 %v465_v9, %v464_v7 }
 0x118   :  { %v467_v12 = vmul.f32 0.125, %v466_v11  ;;  %v468_v13 = vmul.f32 %v458_v10, %v458_v10 }
 0x11a   :  { %v469_v14 = vsub.f32 %v467_v12, %v468_v13 }
 0x11c   :  { %v470_v15 = vmax.f32 %v469_v14, 0.0 }
 0x11e   :  { %v472_v16 = vadd.f32 1e-05, %v470_v15 }
 0x120   :  { %655 = vrsqrt.f32 %v472_v16 }
 0x12a   :  { %v656_v21 = vpop.eup %655 }
 0x12b   :  { %v474_v22 = vmul.f32 %v656_v21, %v471_v19 }
 0x12d   :  { %v482_v24 = vrot.slane %v474_v22, %v481_v20  ;;  %v476_v25 = vmul.f32 %v474_v22, %v458_v10 }
 0x12f   :  { %v477_v26 = vsub.f32 %v475_v23, %v476_v25  ;;  %v484_v27 = vmul.f32 %v482_v24, %v446_v56 }
 0x131   :  { %v489_v28 = vrot.slane %v477_v26, %v481_v20 }
 0x133   :  { %v491_v29 = vadd.f32 %v489_v28, %v484_v27 }
 0x135   :  { %v492_v30 = vmax.f32 %v491_v29, 0.0 }
 0x137   :  { %493 = vst.msk [vmem:[#allocation2] sm:$0xff] %vm327_vm1, %v492_v30 }
 0x138   :  { %668 = shalt.err (!%p665_p4)
}
 0x139   :  { %s669_s20 = scalar_lea.hbm %s852_s4, 128 }
 0x13a   :  { %p670_p5 = scmp.ne.s32.totalorder %s852_s4, %s669_s20  ;;  %p673_p6 = scmp.lt.u32.totalorder %s669_s20, %s852_s4 }
 0x13c   :  { %p675_p7 = pnand %p673_p6, %p670_p5 }
 0x13e   :  { %678 = shalt.err (!%p675_p7)
}
 0x13f   :  { %503 = dma.vmem_to_hbm [thread:$0]  %s501_s18, 128, %s852_s4, [#allocation3]  }
 0x140   :  { %679 = dma.done.wait [#allocation3], 128  }
 0x141   :  { %680 = vsyncadd [#allocation3], 4294967168 }
 0x142   :  { %507 = vsyncpa [#allocation3], 1 }

</bundles_post_ra>
